<compile_context>
chip_gen: v7x
topology: tpu7x:2x2x1
jax: 0.10.0
libtpu: 0.0.40
codegen_flags: <defaults>
</compile_context>

<pallas_src>
import functools

import jax
import jax.numpy as jnp
from jax.experimental import pallas as pl
from jax.experimental.pallas import tpu as pltpu


_SUB = 128  # sub-chunk rows for the conv/softmax stage (bounds vreg live ranges)


def _round_up(x, m):
    return (x + m - 1) // m * m


def informed_sender_kernel(x_ref, w1_ref, w2_ref, w3_ref, w4_ref,
                           probs_ref, emb_ref, *, inv_temp, vocab, chunk):
    """One batch tile of the InformedSender forward pass.

    x_ref    : (Bt, G*F)    bf16  VMEM   batch-major input (fused lin1 layout)
    w1_ref   : (G*F, G*E)   bf16  VMEM   block-diagonal lin1.weight.T
    w2_ref   : (H, G)       f32   SMEM   conv2.weight squeezed
    w3_ref   : (1, H)       f32   SMEM   conv3.weight squeezed
    w4_ref   : (E, Vpad)    bf16  VMEM   lin4.weight.T, zero-padded vocab cols
    probs_ref: (Bt, Vpad)   f32          softmax(lin4(.)/temp); lanes >= V masked
    emb_ref  : (Bt, G*E)    f32          lane-dense emb: emb[b, g*E + e]
    """
    Bt = x_ref.shape[0]
    H, G = w2_ref.shape
    E = emb_ref.shape[1] // G

    # --- fused lin1: single (Bt, G*F) x (G*F, G*E) MXU matmul ----------------
    # One unmasked full-128-lane store of the whole emb tile (G*E == 128).
    emb_ref[...] = jax.lax.dot_general(
        x_ref[...], w1_ref[...], (((1,), (0,)), ((), ())),
        preferred_element_type=jnp.float32)

    w4 = w4_ref[...]                                            # (E, Vpad) bf16

    # --- conv2 -> sigmoid -> conv3 -> sigmoid -> lin4 -> softmax -------------
    # Processed in `chunk`-row sub-slabs so the f32 temporaries stay well under
    # the 64-vreg budget even for 512+ row batch tiles (no regalloc spills).
    def sub_body(c, carry):
        r0 = pl.multiple_of(c * chunk, chunk)
        # Re-load emb slices from VMEM (3 vld/cycle; effectively free) instead
        # of keeping per-g slabs live across the whole tile.
        emb_g = [emb_ref[pl.ds(r0, chunk), pl.ds(g * E, E)] for g in range(G)]

        # conv2 + sigmoid + conv3 + sigmoid on the VPU/EUP (K=G, M=1
        # contractions would waste an MXU pass; scalar weights from SMEM).
        h3_acc = jnp.zeros((chunk, E), jnp.float32)
        for h in range(H):
            acc_h = w2_ref[h, 0] * emb_g[0]
            for g in range(1, G):
                acc_h = acc_h + w2_ref[h, g] * emb_g[g]
            h3_acc = h3_acc + w3_ref[0, h] * jax.nn.sigmoid(acc_h)
        h3 = jax.nn.sigmoid(h3_acc)                             # (chunk, E) f32

        # lin4 (bf16 MXU, f32 acc) + temperature + masked softmax.
        logits = jax.lax.dot_general(
            h3.astype(jnp.bfloat16), w4, (((1,), (0,)), ((), ())),
            preferred_element_type=jnp.float32) * inv_temp      # (chunk, Vpad)
        col = jax.lax.broadcasted_iota(jnp.int32, logits.shape, 1)
        logits = jnp.where(col < vocab, logits, -jnp.inf)       # mask pad vocab
        m = jnp.max(logits, axis=-1, keepdims=True)
        e = jnp.exp(logits - m)
        denom = jnp.sum(e, axis=-1, keepdims=True)
        probs_ref[pl.ds(r0, chunk), :] = e / denom              # exact softmax
        return carry

    n_sub = Bt // chunk
    if n_sub == 1:
        sub_body(0, 0)
    else:
        jax.lax.fori_loop(0, n_sub, sub_body, 0)


@functools.partial(jax.jit, static_argnames=("temp", "block_b"))
def informed_sender_forward(x, w1, w2, w3, w4, *, temp=1.0, block_b=512):
    """x: (game_size, batch, feat) f32. Returns (probs (B, V), emb (B, 1, G, E))."""
    G, B, F = x.shape
    E = w1.shape[0]
    V = w4.shape[0]

    # ---- batch tiling -------------------------------------------------------
    if B <= _SUB:
        B_tile = _round_up(B, 8)         # single sub-chunk, no inner loop
        chunk = B_tile
    else:
        B_rounded = _round_up(B, _SUB)
        B_tile = min(B_rounded, block_b)
        # v7x megacore: prefer >= 2 "parallel" grid steps when the halved tile
        # still has >= 256 rows (v5e/v6e have one TC and are unaffected).
        half = _round_up(pl.cdiv(B_rounded, 2), _SUB)
        if 256 <= half < B_tile:
            B_tile = half
        chunk = _SUB
    assert B_tile % chunk == 0
    B_pad = _round_up(B, B_tile)
    V_pad = _round_up(V, 128)            # lane-dense probs output
    grid = (B_pad // B_tile,)

    # ---- input / weight prep (done once, in the wrapper) --------------------
    # x: (G, B, F) -> batch-major (B_pad, G*F) bf16 so lin1 is one MXU matmul
    # and the x tile is a single contiguous, lane-dense DMA slab per step.
    x_bm = jnp.transpose(x, (1, 0, 2)).reshape(B, G * F)
    if B_pad != B:
        x_bm = jnp.pad(x_bm, ((0, B_pad - B), (0, 0)))
    x_bm = x_bm.astype(jnp.bfloat16)

    # Block-diagonal lin1 weight: block g of (G*F, G*E) is w1.T (zero padding
    # contributes exactly 0 to the f32 accumulation).
    w1_bd = jnp.zeros((G * F, G * E), jnp.float32)
    for g in range(G):
        w1_bd = w1_bd.at[g * F:(g + 1) * F, g * E:(g + 1) * E].set(w1.T)
    w1_bd = w1_bd.astype(jnp.bfloat16)

    # lin4 weight zero-padded to V_pad rows, pre-transposed to (E, V_pad) so
    # the MXU RHS is already (K, N).
    w4_t = jnp.pad(w4, ((0, V_pad - V), (0, 0))).T.astype(jnp.bfloat16)

    w2_f = w2.astype(jnp.float32)
    w3_f = w3.astype(jnp.float32)

    kernel = functools.partial(
        informed_sender_kernel,
        inv_temp=float(1.0 / temp), vocab=V, chunk=chunk)

    probs_p, emb_p = pl.pallas_call(
        kernel,
        grid=grid,
        in_specs=[
            pl.BlockSpec((B_tile, G * F), lambda b: (b, 0)),      # x batch tile
            pl.BlockSpec((G * F, G * E), lambda b: (0, 0)),       # w1, resident
            pl.BlockSpec(memory_space=pltpu.MemorySpace.SMEM),    # w2 scalars
            pl.BlockSpec(memory_space=pltpu.MemorySpace.SMEM),    # w3 scalars
            pl.BlockSpec((E, V_pad), lambda b: (0, 0)),           # w4, resident
        ],
        out_specs=(
            pl.BlockSpec((B_tile, V_pad), lambda b: (b, 0)),      # probs
            pl.BlockSpec((B_tile, G * E), lambda b: (b, 0)),      # emb
        ),
        out_shape=(
            jax.ShapeDtypeStruct((B_pad, V_pad), jnp.float32),
            jax.ShapeDtypeStruct((B_pad, G * E), jnp.float32),
        ),
        compiler_params=pltpu.CompilerParams(
            dimension_semantics=("parallel",),   # shard batch tiles across TCs
            vmem_limit_bytes=32 * 1024 * 1024,   # per-step working set << limit
        ),
    )(x_bm, w1_bd, w2_f, w3_f, w4_t)

    probs = probs_p[:B, :V]
    # Lane-dense (B, G*E) -> PyTorch (B, 1, G, E): pure row-major reshape.
    emb = emb_p[:B].reshape(B, 1, G, E)
    return probs, emb


def _reference_forward(x, w1, w2, w3, w4, temp=1.0):
    """Pure-JAX reference mirroring the PyTorch module (with the kernel's
    bf16-input / f32-accumulate matmul precision for apples-to-apples checks)."""
    xb = x.astype(jnp.bfloat16)
    w1b = w1.astype(jnp.bfloat16)
    w4b = w4.astype(jnp.bfloat16)
    emb = jnp.einsum("gbf,ef->bge", xb, w1b,
                     preferred_element_type=jnp.float32)        # (B, G, E)
    h2 = jax.nn.sigmoid(jnp.einsum("hg,bge->bhe", w2, emb))     # conv2 + sigmoid
    h3 = jax.nn.sigmoid(jnp.einsum("oh,bhe->be", w3, h2))       # conv3 + sigmoid
    logits = jnp.einsum("be,ve->bv", h3.astype(jnp.bfloat16), w4b,
                        preferred_element_type=jnp.float32) / temp
    probs = jax.nn.softmax(logits, axis=1)
    return probs, emb[:, None, :, :]


if __name__ == "__main__":
    # Small, module-consistent shapes.
    game_size = 4
    batch = 2
    feat_size = 16
    embedding_size = 32
    hidden_size = 16
    vocab_size = 100
    temp = 1.0

    key = jax.random.PRNGKey(0)
    k_x, k1, k2, k3, k4, k_x2, k_x3 = jax.random.split(key, 7)

    # Input: (game_size, batch, feat) — matches PyTorch's x[i] indexing.
    x = jax.random.normal(k_x, (game_size, batch, feat_size), dtype=jnp.float32)

    # Deterministic uniform(-0.08, 0.08) init matching init_weights().
    def u(k, shape):
        return jax.random.uniform(k, shape, jnp.float32, -0.08, 0.08)

    w1 = u(k1, (embedding_size, feat_size))      # lin1.weight  (out, in)
    w2 = u(k2, (hidden_size, game_size))         # conv2.weight (H,1,G,1) squeezed
    w3 = u(k3, (1, hidden_size))                 # conv3.weight (1,1,H,1) squeezed
    w4 = u(k4, (vocab_size, embedding_size))     # lin4.weight  (out, in)

    # Tiny batch: single 8-row tile, single sub-chunk.
    probs, emb = informed_sender_forward(x, w1, w2, w3, w4, temp=temp)
    probs, emb = jax.block_until_ready((probs, emb))
    ref_probs, ref_emb = _reference_forward(x, w1, w2, w3, w4, temp=temp)
    assert probs.shape == (batch, vocab_size)
    assert emb.shape == (batch, 1, game_size, embedding_size)
    assert jnp.allclose(emb, ref_emb, atol=1e-4, rtol=1e-4)
    assert jnp.allclose(probs, ref_probs, atol=5e-4, rtol=5e-3)
    assert jnp.allclose(jnp.sum(probs, axis=1), 1.0, atol=1e-4)

    # Medium batch: single 256-row tile, two 128-row sub-chunks, batch padding,
    # non-unit temperature.
    batch2, temp2 = 200, 2.0
    x2 = jax.random.normal(k_x2, (game_size, batch2, feat_size), dtype=jnp.float32)
    probs2, emb2 = informed_sender_forward(x2, w1, w2, w3, w4, temp=temp2)
    probs2, emb2 = jax.block_until_ready((probs2, emb2))
    ref_probs2, ref_emb2 = _reference_forward(x2, w1, w2, w3, w4, temp=temp2)
    assert probs2.shape == (batch2, vocab_size)
    assert emb2.shape == (batch2, 1, game_size, embedding_size)
    assert jnp.allclose(emb2, ref_emb2, atol=1e-4, rtol=1e-4)
    assert jnp.allclose(probs2, ref_probs2, atol=5e-4, rtol=5e-3)

    # Larger batch: exercises the multi-step grid (v7x two-TC split: 2 x 384-row
    # tiles), the in-kernel fori_loop over sub-chunks, and batch padding.
    batch3 = 600
    x3 = jax.random.normal(k_x3, (game_size, batch3, feat_size), dtype=jnp.float32)
    probs3, emb3 = informed_sender_forward(x3, w1, w2, w3, w4, temp=temp)
    probs3, emb3 = jax.block_until_ready((probs3, emb3))
    ref_probs3, ref_emb3 = _reference_forward(x3, w1, w2, w3, w4, temp=temp)
    assert probs3.shape == (batch3, vocab_size)
    assert emb3.shape == (batch3, 1, game_size, embedding_size)
    assert jnp.allclose(emb3, ref_emb3, atol=1e-4, rtol=1e-4)
    assert jnp.allclose(probs3, ref_probs3, atol=5e-4, rtol=5e-3)

    print("KERNEL_OK")
</pallas_src>

<mosaic_0001>
module attributes {stable_mosaic.version = 11 : i64} {
  func.func @informed_sender_kernel(%arg0: i32, %arg1: memref<8x64xbf16, #tpu.memory_space<vmem>>, %arg2: memref<64x128xbf16, #tpu.memory_space<vmem>>, %arg3: memref<16x4xf32, #tpu.memory_space<smem>>, %arg4: memref<1x16xf32, #tpu.memory_space<smem>>, %arg5: memref<32x128xbf16, #tpu.memory_space<vmem>>, %arg6: memref<8x128xf32, #tpu.memory_space<vmem>>, %arg7: memref<8x128xf32, #tpu.memory_space<vmem>>) attributes {dimension_semantics = [#tpu.dimension_semantics<parallel>], iteration_bounds = array<i64: 1>, scalar_prefetch = 0 : i64, scratch_operands = 0 : i64, tpu.core_type = #tpu.core_type<tc>, window_params = [{transform_indices = @transform_0, window_bounds = array<i64: 8, 64>}, {pipeline_mode = #tpu.pipeline_mode<synchronous>, transform_indices = @transform_1, window_bounds = array<i64: 64, 128>}, {transform_indices = @transform_2, window_bounds = array<i64: 16, 4>}, {transform_indices = @transform_3, window_bounds = array<i64: 1, 16>}, {pipeline_mode = #tpu.pipeline_mode<synchronous>, transform_indices = @transform_4, window_bounds = array<i64: 32, 128>}, {transform_indices = @transform_5, window_bounds = array<i64: 8, 128>}, {transform_indices = @transform_6, window_bounds = array<i64: 8, 128>}]} {
    %c0 = arith.constant 0 : index
    %c0_0 = arith.constant 0 : index
    %0 = vector.load %arg1[%c0, %c0_0] : memref<8x64xbf16, #tpu.memory_space<vmem>>, vector<8x64xbf16>
    %c0_1 = arith.constant 0 : index
    %c0_2 = arith.constant 0 : index
    %1 = vector.load %arg2[%c0_1, %c0_2] : memref<64x128xbf16, #tpu.memory_space<vmem>>, vector<64x128xbf16>
    %cst = arith.constant dense<0.000000e+00> : vector<8x128xf32>
    %2 = tpu.matmul %0, %1, %cst {dimension_numbers = #tpu.dot_dimension_numbers<[1], [0], [0], [1], [0, 0, 1, 1], [], []>} : vector<8x64xbf16>, vector<64x128xbf16>, vector<8x128xf32> -> vector<8x128xf32>
    %c0_3 = arith.constant 0 : index
    %c0_4 = arith.constant 0 : index
    %3 = vector.load %arg7[%c0_3, %c0_4] : memref<8x128xf32, #tpu.memory_space<vmem>>, vector<8x128xf32>
    tpu.vector_store %arg7[%c0_3, %c0_4], %2 {strides = array<i32>} : memref<8x128xf32, #tpu.memory_space<vmem>>, vector<8x128xf32>,
    %c0_5 = arith.constant 0 : index
    %c0_6 = arith.constant 0 : index
    %4 = vector.load %arg5[%c0_5, %c0_6] : memref<32x128xbf16, #tpu.memory_space<vmem>>, vector<32x128xbf16>
    %c0_i32 = arith.constant 0 : i32
    %5 = tpu.assume_multiple %c0_i32, 8 : i32
    %6 = arith.index_cast %5 : i32 to index
    %c0_7 = arith.constant 0 : index
    %7 = vector.load %arg7[%6, %c0_7] : memref<8x128xf32, #tpu.memory_space<vmem>>, vector<8x32xf32>
    %8 = arith.index_cast %5 : i32 to index
    %c32 = arith.constant 32 : index
    %9 = vector.load %arg7[%8, %c32] : memref<8x128xf32, #tpu.memory_space<vmem>>, vector<8x32xf32>
    %10 = arith.index_cast %5 : i32 to index
    %c64 = arith.constant 64 : index
    %11 = vector.load %arg7[%10, %c64] : memref<8x128xf32, #tpu.memory_space<vmem>>, vector<8x32xf32>
    %12 = arith.index_cast %5 : i32 to index
    %c96 = arith.constant 96 : index
    %13 = vector.load %arg7[%12, %c96] : memref<8x128xf32, #tpu.memory_space<vmem>>, vector<8x32xf32>
    %cst_8 = arith.constant 0.000000e+00 : f32
    %14 = vector.broadcast %cst_8 : f32 to vector<8x32xf32>
    %c0_9 = arith.constant 0 : index
    %c0_10 = arith.constant 0 : index
    %15 = memref.load %arg3[%c0_9, %c0_10] : memref<16x4xf32, #tpu.memory_space<smem>>
    %16 = vector.broadcast %15 : f32 to vector<8x32xf32>
    %17 = arith.mulf %16, %7 : vector<8x32xf32>
    %c0_11 = arith.constant 0 : index
    %c1 = arith.constant 1 : index
    %18 = memref.load %arg3[%c0_11, %c1] : memref<16x4xf32, #tpu.memory_space<smem>>
    %19 = vector.broadcast %18 : f32 to vector<8x32xf32>
    %20 = arith.mulf %19, %9 : vector<8x32xf32>
    %21 = arith.addf %17, %20 : vector<8x32xf32>
    %c0_12 = arith.constant 0 : index
    %c2 = arith.constant 2 : index
    %22 = memref.load %arg3[%c0_12, %c2] : memref<16x4xf32, #tpu.memory_space<smem>>
    %23 = vector.broadcast %22 : f32 to vector<8x32xf32>
    %24 = arith.mulf %23, %11 : vector<8x32xf32>
    %25 = arith.addf %21, %24 : vector<8x32xf32>
    %c0_13 = arith.constant 0 : index
    %c3 = arith.constant 3 : index
    %26 = memref.load %arg3[%c0_13, %c3] : memref<16x4xf32, #tpu.memory_space<smem>>
    %27 = vector.broadcast %26 : f32 to vector<8x32xf32>
    %28 = arith.mulf %27, %13 : vector<8x32xf32>
    %29 = arith.addf %25, %28 : vector<8x32xf32>
    %c0_14 = arith.constant 0 : index
    %c0_15 = arith.constant 0 : index
    %30 = memref.load %arg4[%c0_14, %c0_15] : memref<1x16xf32, #tpu.memory_space<smem>>
    %31 = arith.negf %29 : vector<8x32xf32>
    %32 = math.exp %31 : vector<8x32xf32>
    %cst_16 = arith.constant 1.000000e+00 : f32
    %33 = vector.broadcast %cst_16 : f32 to vector<8x32xf32>
    %34 = arith.addf %33, %32 : vector<8x32xf32>
    %35 = arith.divf %33, %34 : vector<8x32xf32>
    %36 = vector.broadcast %30 : f32 to vector<8x32xf32>
    %37 = arith.mulf %36, %35 : vector<8x32xf32>
    %38 = arith.addf %14, %37 : vector<8x32xf32>
    %c1_17 = arith.constant 1 : index
    %c0_18 = arith.constant 0 : index
    %39 = memref.load %arg3[%c1_17, %c0_18] : memref<16x4xf32, #tpu.memory_space<smem>>
    %40 = vector.broadcast %39 : f32 to vector<8x32xf32>
    %41 = arith.mulf %40, %7 : vector<8x32xf32>
    %c1_19 = arith.constant 1 : index
    %c1_20 = arith.constant 1 : index
    %42 = memref.load %arg3[%c1_19, %c1_20] : memref<16x4xf32, #tpu.memory_space<smem>>
    %43 = vector.broadcast %42 : f32 to vector<8x32xf32>
    %44 = arith.mulf %43, %9 : vector<8x32xf32>
    %45 = arith.addf %41, %44 : vector<8x32xf32>
    %c1_21 = arith.constant 1 : index
    %c2_22 = arith.constant 2 : index
    %46 = memref.load %arg3[%c1_21, %c2_22] : memref<16x4xf32, #tpu.memory_space<smem>>
    %47 = vector.broadcast %46 : f32 to vector<8x32xf32>
    %48 = arith.mulf %47, %11 : vector<8x32xf32>
    %49 = arith.addf %45, %48 : vector<8x32xf32>
    %c1_23 = arith.constant 1 : index
    %c3_24 = arith.constant 3 : index
    %50 = memref.load %arg3[%c1_23, %c3_24] : memref<16x4xf32, #tpu.memory_space<smem>>
    %51 = vector.broadcast %50 : f32 to vector<8x32xf32>
    %52 = arith.mulf %51, %13 : vector<8x32xf32>
    %53 = arith.addf %49, %52 : vector<8x32xf32>
    %c0_25 = arith.constant 0 : index
    %c1_26 = arith.constant 1 : index
    %54 = memref.load %arg4[%c0_25, %c1_26] : memref<1x16xf32, #tpu.memory_space<smem>>
    %55 = arith.negf %53 : vector<8x32xf32>
    %56 = math.exp %55 : vector<8x32xf32>
    %cst_27 = arith.constant 1.000000e+00 : f32
    %57 = vector.broadcast %cst_27 : f32 to vector<8x32xf32>
    %58 = arith.addf %57, %56 : vector<8x32xf32>
    %59 = arith.divf %57, %58 : vector<8x32xf32>
    %60 = vector.broadcast %54 : f32 to vector<8x32xf32>
    %61 = arith.mulf %60, %59 : vector<8x32xf32>
    %62 = arith.addf %38, %61 : vector<8x32xf32>
    %c2_28 = arith.constant 2 : index
    %c0_29 = arith.constant 0 : index
    %63 = memref.load %arg3[%c2_28, %c0_29] : memref<16x4xf32, #tpu.memory_space<smem>>
    %64 = vector.broadcast %63 : f32 to vector<8x32xf32>
    %65 = arith.mulf %64, %7 : vector<8x32xf32>
    %c2_30 = arith.constant 2 : index
    %c1_31 = arith.constant 1 : index
    %66 = memref.load %arg3[%c2_30, %c1_31] : memref<16x4xf32, #tpu.memory_space<smem>>
    %67 = vector.broadcast %66 : f32 to vector<8x32xf32>
    %68 = arith.mulf %67, %9 : vector<8x32xf32>
    %69 = arith.addf %65, %68 : vector<8x32xf32>
    %c2_32 = arith.constant 2 : index
    %c2_33 = arith.constant 2 : index
    %70 = memref.load %arg3[%c2_32, %c2_33] : memref<16x4xf32, #tpu.memory_space<smem>>
    %71 = vector.broadcast %70 : f32 to vector<8x32xf32>
    %72 = arith.mulf %71, %11 : vector<8x32xf32>
    %73 = arith.addf %69, %72 : vector<8x32xf32>
    %c2_34 = arith.constant 2 : index
    %c3_35 = arith.constant 3 : index
    %74 = memref.load %arg3[%c2_34, %c3_35] : memref<16x4xf32, #tpu.memory_space<smem>>
    %75 = vector.broadcast %74 : f32 to vector<8x32xf32>
    %76 = arith.mulf %75, %13 : vector<8x32xf32>
    %77 = arith.addf %73, %76 : vector<8x32xf32>
    %c0_36 = arith.constant 0 : index
    %c2_37 = arith.constant 2 : index
    %78 = memref.load %arg4[%c0_36, %c2_37] : memref<1x16xf32, #tpu.memory_space<smem>>
    %79 = arith.negf %77 : vector<8x32xf32>
    %80 = math.exp %79 : vector<8x32xf32>
    %cst_38 = arith.constant 1.000000e+00 : f32
    %81 = vector.broadcast %cst_38 : f32 to vector<8x32xf32>
    %82 = arith.addf %81, %80 : vector<8x32xf32>
    %83 = arith.divf %81, %82 : vector<8x32xf32>
    %84 = vector.broadcast %78 : f32 to vector<8x32xf32>
    %85 = arith.mulf %84, %83 : vector<8x32xf32>
    %86 = arith.addf %62, %85 : vector<8x32xf32>
    %c3_39 = arith.constant 3 : index
    %c0_40 = arith.constant 0 : index
    %87 = memref.load %arg3[%c3_39, %c0_40] : memref<16x4xf32, #tpu.memory_space<smem>>
    %88 = vector.broadcast %87 : f32 to vector<8x32xf32>
    %89 = arith.mulf %88, %7 : vector<8x32xf32>
    %c3_41 = arith.constant 3 : index
    %c1_42 = arith.constant 1 : index
    %90 = memref.load %arg3[%c3_41, %c1_42] : memref<16x4xf32, #tpu.memory_space<smem>>
    %91 = vector.broadcast %90 : f32 to vector<8x32xf32>
    %92 = arith.mulf %91, %9 : vector<8x32xf32>
    %93 = arith.addf %89, %92 : vector<8x32xf32>
    %c3_43 = arith.constant 3 : index
    %c2_44 = arith.constant 2 : index
    %94 = memref.load %arg3[%c3_43, %c2_44] : memref<16x4xf32, #tpu.memory_space<smem>>
    %95 = vector.broadcast %94 : f32 to vector<8x32xf32>
    %96 = arith.mulf %95, %11 : vector<8x32xf32>
    %97 = arith.addf %93, %96 : vector<8x32xf32>
    %c3_45 = arith.constant 3 : index
    %c3_46 = arith.constant 3 : index
    %98 = memref.load %arg3[%c3_45, %c3_46] : memref<16x4xf32, #tpu.memory_space<smem>>
    %99 = vector.broadcast %98 : f32 to vector<8x32xf32>
    %100 = arith.mulf %99, %13 : vector<8x32xf32>
    %101 = arith.addf %97, %100 : vector<8x32xf32>
    %c0_47 = arith.constant 0 : index
    %c3_48 = arith.constant 3 : index
    %102 = memref.load %arg4[%c0_47, %c3_48] : memref<1x16xf32, #tpu.memory_space<smem>>
    %103 = arith.negf %101 : vector<8x32xf32>
    %104 = math.exp %103 : vector<8x32xf32>
    %cst_49 = arith.constant 1.000000e+00 : f32
    %105 = vector.broadcast %cst_49 : f32 to vector<8x32xf32>
    %106 = arith.addf %105, %104 : vector<8x32xf32>
    %107 = arith.divf %105, %106 : vector<8x32xf32>
    %108 = vector.broadcast %102 : f32 to vector<8x32xf32>
    %109 = arith.mulf %108, %107 : vector<8x32xf32>
    %110 = arith.addf %86, %109 : vector<8x32xf32>
    %c4 = arith.constant 4 : index
    %c0_50 = arith.constant 0 : index
    %111 = memref.load %arg3[%c4, %c0_50] : memref<16x4xf32, #tpu.memory_space<smem>>
    %112 = vector.broadcast %111 : f32 to vector<8x32xf32>
    %113 = arith.mulf %112, %7 : vector<8x32xf32>
    %c4_51 = arith.constant 4 : index
    %c1_52 = arith.constant 1 : index
    %114 = memref.load %arg3[%c4_51, %c1_52] : memref<16x4xf32, #tpu.memory_space<smem>>
    %115 = vector.broadcast %114 : f32 to vector<8x32xf32>
    %116 = arith.mulf %115, %9 : vector<8x32xf32>
    %117 = arith.addf %113, %116 : vector<8x32xf32>
    %c4_53 = arith.constant 4 : index
    %c2_54 = arith.constant 2 : index
    %118 = memref.load %arg3[%c4_53, %c2_54] : memref<16x4xf32, #tpu.memory_space<smem>>
    %119 = vector.broadcast %118 : f32 to vector<8x32xf32>
    %120 = arith.mulf %119, %11 : vector<8x32xf32>
    %121 = arith.addf %117, %120 : vector<8x32xf32>
    %c4_55 = arith.constant 4 : index
    %c3_56 = arith.constant 3 : index
    %122 = memref.load %arg3[%c4_55, %c3_56] : memref<16x4xf32, #tpu.memory_space<smem>>
    %123 = vector.broadcast %122 : f32 to vector<8x32xf32>
    %124 = arith.mulf %123, %13 : vector<8x32xf32>
    %125 = arith.addf %121, %124 : vector<8x32xf32>
    %c0_57 = arith.constant 0 : index
    %c4_58 = arith.constant 4 : index
    %126 = memref.load %arg4[%c0_57, %c4_58] : memref<1x16xf32, #tpu.memory_space<smem>>
    %127 = arith.negf %125 : vector<8x32xf32>
    %128 = math.exp %127 : vector<8x32xf32>
    %cst_59 = arith.constant 1.000000e+00 : f32
    %129 = vector.broadcast %cst_59 : f32 to vector<8x32xf32>
    %130 = arith.addf %129, %128 : vector<8x32xf32>
    %131 = arith.divf %129, %130 : vector<8x32xf32>
    %132 = vector.broadcast %126 : f32 to vector<8x32xf32>
    %133 = arith.mulf %132, %131 : vector<8x32xf32>
    %134 = arith.addf %110, %133 : vector<8x32xf32>
    %c5 = arith.constant 5 : index
    %c0_60 = arith.constant 0 : index
    %135 = memref.load %arg3[%c5, %c0_60] : memref<16x4xf32, #tpu.memory_space<smem>>
    %136 = vector.broadcast %135 : f32 to vector<8x32xf32>
    %137 = arith.mulf %136, %7 : vector<8x32xf32>
    %c5_61 = arith.constant 5 : index
    %c1_62 = arith.constant 1 : index
    %138 = memref.load %arg3[%c5_61, %c1_62] : memref<16x4xf32, #tpu.memory_space<smem>>
    %139 = vector.broadcast %138 : f32 to vector<8x32xf32>
    %140 = arith.mulf %139, %9 : vector<8x32xf32>
    %141 = arith.addf %137, %140 : vector<8x32xf32>
    %c5_63 = arith.constant 5 : index
    %c2_64 = arith.constant 2 : index
    %142 = memref.load %arg3[%c5_63, %c2_64] : memref<16x4xf32, #tpu.memory_space<smem>>
    %143 = vector.broadcast %142 : f32 to vector<8x32xf32>
    %144 = arith.mulf %143, %11 : vector<8x32xf32>
    %145 = arith.addf %141, %144 : vector<8x32xf32>
    %c5_65 = arith.constant 5 : index
    %c3_66 = arith.constant 3 : index
    %146 = memref.load %arg3[%c5_65, %c3_66] : memref<16x4xf32, #tpu.memory_space<smem>>
    %147 = vector.broadcast %146 : f32 to vector<8x32xf32>
    %148 = arith.mulf %147, %13 : vector<8x32xf32>
    %149 = arith.addf %145, %148 : vector<8x32xf32>
    %c0_67 = arith.constant 0 : index
    %c5_68 = arith.constant 5 : index
    %150 = memref.load %arg4[%c0_67, %c5_68] : memref<1x16xf32, #tpu.memory_space<smem>>
    %151 = arith.negf %149 : vector<8x32xf32>
    %152 = math.exp %151 : vector<8x32xf32>
    %cst_69 = arith.constant 1.000000e+00 : f32
    %153 = vector.broadcast %cst_69 : f32 to vector<8x32xf32>
    %154 = arith.addf %153, %152 : vector<8x32xf32>
    %155 = arith.divf %153, %154 : vector<8x32xf32>
    %156 = vector.broadcast %150 : f32 to vector<8x32xf32>
    %157 = arith.mulf %156, %155 : vector<8x32xf32>
    %158 = arith.addf %134, %157 : vector<8x32xf32>
    %c6 = arith.constant 6 : index
    %c0_70 = arith.constant 0 : index
    %159 = memref.load %arg3[%c6, %c0_70] : memref<16x4xf32, #tpu.memory_space<smem>>
    %160 = vector.broadcast %159 : f32 to vector<8x32xf32>
    %161 = arith.mulf %160, %7 : vector<8x32xf32>
    %c6_71 = arith.constant 6 : index
    %c1_72 = arith.constant 1 : index
    %162 = memref.load %arg3[%c6_71, %c1_72] : memref<16x4xf32, #tpu.memory_space<smem>>
    %163 = vector.broadcast %162 : f32 to vector<8x32xf32>
    %164 = arith.mulf %163, %9 : vector<8x32xf32>
    %165 = arith.addf %161, %164 : vector<8x32xf32>
    %c6_73 = arith.constant 6 : index
    %c2_74 = arith.constant 2 : index
    %166 = memref.load %arg3[%c6_73, %c2_74] : memref<16x4xf32, #tpu.memory_space<smem>>
    %167 = vector.broadcast %166 : f32 to vector<8x32xf32>
    %168 = arith.mulf %167, %11 : vector<8x32xf32>
    %169 = arith.addf %165, %168 : vector<8x32xf32>
    %c6_75 = arith.constant 6 : index
    %c3_76 = arith.constant 3 : index
    %170 = memref.load %arg3[%c6_75, %c3_76] : memref<16x4xf32, #tpu.memory_space<smem>>
    %171 = vector.broadcast %170 : f32 to vector<8x32xf32>
    %172 = arith.mulf %171, %13 : vector<8x32xf32>
    %173 = arith.addf %169, %172 : vector<8x32xf32>
    %c0_77 = arith.constant 0 : index
    %c6_78 = arith.constant 6 : index
    %174 = memref.load %arg4[%c0_77, %c6_78] : memref<1x16xf32, #tpu.memory_space<smem>>
    %175 = arith.negf %173 : vector<8x32xf32>
    %176 = math.exp %175 : vector<8x32xf32>
    %cst_79 = arith.constant 1.000000e+00 : f32
    %177 = vector.broadcast %cst_79 : f32 to vector<8x32xf32>
    %178 = arith.addf %177, %176 : vector<8x32xf32>
    %179 = arith.divf %177, %178 : vector<8x32xf32>
    %180 = vector.broadcast %174 : f32 to vector<8x32xf32>
    %181 = arith.mulf %180, %179 : vector<8x32xf32>
    %182 = arith.addf %158, %181 : vector<8x32xf32>
    %c7 = arith.constant 7 : index
    %c0_80 = arith.constant 0 : index
    %183 = memref.load %arg3[%c7, %c0_80] : memref<16x4xf32, #tpu.memory_space<smem>>
    %184 = vector.broadcast %183 : f32 to vector<8x32xf32>
    %185 = arith.mulf %184, %7 : vector<8x32xf32>
    %c7_81 = arith.constant 7 : index
    %c1_82 = arith.constant 1 : index
    %186 = memref.load %arg3[%c7_81, %c1_82] : memref<16x4xf32, #tpu.memory_space<smem>>
    %187 = vector.broadcast %186 : f32 to vector<8x32xf32>
    %188 = arith.mulf %187, %9 : vector<8x32xf32>
    %189 = arith.addf %185, %188 : vector<8x32xf32>
    %c7_83 = arith.constant 7 : index
    %c2_84 = arith.constant 2 : index
    %190 = memref.load %arg3[%c7_83, %c2_84] : memref<16x4xf32, #tpu.memory_space<smem>>
    %191 = vector.broadcast %190 : f32 to vector<8x32xf32>
    %192 = arith.mulf %191, %11 : vector<8x32xf32>
    %193 = arith.addf %189, %192 : vector<8x32xf32>
    %c7_85 = arith.constant 7 : index
    %c3_86 = arith.constant 3 : index
    %194 = memref.load %arg3[%c7_85, %c3_86] : memref<16x4xf32, #tpu.memory_space<smem>>
    %195 = vector.broadcast %194 : f32 to vector<8x32xf32>
    %196 = arith.mulf %195, %13 : vector<8x32xf32>
    %197 = arith.addf %193, %196 : vector<8x32xf32>
    %c0_87 = arith.constant 0 : index
    %c7_88 = arith.constant 7 : index
    %198 = memref.load %arg4[%c0_87, %c7_88] : memref<1x16xf32, #tpu.memory_space<smem>>
    %199 = arith.negf %197 : vector<8x32xf32>
    %200 = math.exp %199 : vector<8x32xf32>
    %cst_89 = arith.constant 1.000000e+00 : f32
    %201 = vector.broadcast %cst_89 : f32 to vector<8x32xf32>
    %202 = arith.addf %201, %200 : vector<8x32xf32>
    %203 = arith.divf %201, %202 : vector<8x32xf32>
    %204 = vector.broadcast %198 : f32 to vector<8x32xf32>
    %205 = arith.mulf %204, %203 : vector<8x32xf32>
    %206 = arith.addf %182, %205 : vector<8x32xf32>
    %c8 = arith.constant 8 : index
    %c0_90 = arith.constant 0 : index
    %207 = memref.load %arg3[%c8, %c0_90] : memref<16x4xf32, #tpu.memory_space<smem>>
    %208 = vector.broadcast %207 : f32 to vector<8x32xf32>
    %209 = arith.mulf %208, %7 : vector<8x32xf32>
    %c8_91 = arith.constant 8 : index
    %c1_92 = arith.constant 1 : index
    %210 = memref.load %arg3[%c8_91, %c1_92] : memref<16x4xf32, #tpu.memory_space<smem>>
    %211 = vector.broadcast %210 : f32 to vector<8x32xf32>
    %212 = arith.mulf %211, %9 : vector<8x32xf32>
    %213 = arith.addf %209, %212 : vector<8x32xf32>
    %c8_93 = arith.constant 8 : index
    %c2_94 = arith.constant 2 : index
    %214 = memref.load %arg3[%c8_93, %c2_94] : memref<16x4xf32, #tpu.memory_space<smem>>
    %215 = vector.broadcast %214 : f32 to vector<8x32xf32>
    %216 = arith.mulf %215, %11 : vector<8x32xf32>
    %217 = arith.addf %213, %216 : vector<8x32xf32>
    %c8_95 = arith.constant 8 : index
    %c3_96 = arith.constant 3 : index
    %218 = memref.load %arg3[%c8_95, %c3_96] : memref<16x4xf32, #tpu.memory_space<smem>>
    %219 = vector.broadcast %218 : f32 to vector<8x32xf32>
    %220 = arith.mulf %219, %13 : vector<8x32xf32>
    %221 = arith.addf %217, %220 : vector<8x32xf32>
    %c0_97 = arith.constant 0 : index
    %c8_98 = arith.constant 8 : index
    %222 = memref.load %arg4[%c0_97, %c8_98] : memref<1x16xf32, #tpu.memory_space<smem>>
    %223 = arith.negf %221 : vector<8x32xf32>
    %224 = math.exp %223 : vector<8x32xf32>
    %cst_99 = arith.constant 1.000000e+00 : f32
    %225 = vector.broadcast %cst_99 : f32 to vector<8x32xf32>
    %226 = arith.addf %225, %224 : vector<8x32xf32>
    %227 = arith.divf %225, %226 : vector<8x32xf32>
    %228 = vector.broadcast %222 : f32 to vector<8x32xf32>
    %229 = arith.mulf %228, %227 : vector<8x32xf32>
    %230 = arith.addf %206, %229 : vector<8x32xf32>
    %c9 = arith.constant 9 : index
    %c0_100 = arith.constant 0 : index
    %231 = memref.load %arg3[%c9, %c0_100] : memref<16x4xf32, #tpu.memory_space<smem>>
    %232 = vector.broadcast %231 : f32 to vector<8x32xf32>
    %233 = arith.mulf %232, %7 : vector<8x32xf32>
    %c9_101 = arith.constant 9 : index
    %c1_102 = arith.constant 1 : index
    %234 = memref.load %arg3[%c9_101, %c1_102] : memref<16x4xf32, #tpu.memory_space<smem>>
    %235 = vector.broadcast %234 : f32 to vector<8x32xf32>
    %236 = arith.mulf %235, %9 : vector<8x32xf32>
    %237 = arith.addf %233, %236 : vector<8x32xf32>
    %c9_103 = arith.constant 9 : index
    %c2_104 = arith.constant 2 : index
    %238 = memref.load %arg3[%c9_103, %c2_104] : memref<16x4xf32, #tpu.memory_space<smem>>
    %239 = vector.broadcast %238 : f32 to vector<8x32xf32>
    %240 = arith.mulf %239, %11 : vector<8x32xf32>
    %241 = arith.addf %237, %240 : vector<8x32xf32>
    %c9_105 = arith.constant 9 : index
    %c3_106 = arith.constant 3 : index
    %242 = memref.load %arg3[%c9_105, %c3_106] : memref<16x4xf32, #tpu.memory_space<smem>>
    %243 = vector.broadcast %242 : f32 to vector<8x32xf32>
    %244 = arith.mulf %243, %13 : vector<8x32xf32>
    %245 = arith.addf %241, %244 : vector<8x32xf32>
    %c0_107 = arith.constant 0 : index
    %c9_108 = arith.constant 9 : index
    %246 = memref.load %arg4[%c0_107, %c9_108] : memref<1x16xf32, #tpu.memory_space<smem>>
    %247 = arith.negf %245 : vector<8x32xf32>
    %248 = math.exp %247 : vector<8x32xf32>
    %cst_109 = arith.constant 1.000000e+00 : f32
    %249 = vector.broadcast %cst_109 : f32 to vector<8x32xf32>
    %250 = arith.addf %249, %248 : vector<8x32xf32>
    %251 = arith.divf %249, %250 : vector<8x32xf32>
    %252 = vector.broadcast %246 : f32 to vector<8x32xf32>
    %253 = arith.mulf %252, %251 : vector<8x32xf32>
    %254 = arith.addf %230, %253 : vector<8x32xf32>
    %c10 = arith.constant 10 : index
    %c0_110 = arith.constant 0 : index
    %255 = memref.load %arg3[%c10, %c0_110] : memref<16x4xf32, #tpu.memory_space<smem>>
    %256 = vector.broadcast %255 : f32 to vector<8x32xf32>
    %257 = arith.mulf %256, %7 : vector<8x32xf32>
    %c10_111 = arith.constant 10 : index
    %c1_112 = arith.constant 1 : index
    %258 = memref.load %arg3[%c10_111, %c1_112] : memref<16x4xf32, #tpu.memory_space<smem>>
    %259 = vector.broadcast %258 : f32 to vector<8x32xf32>
    %260 = arith.mulf %259, %9 : vector<8x32xf32>
    %261 = arith.addf %257, %260 : vector<8x32xf32>
    %c10_113 = arith.constant 10 : index
    %c2_114 = arith.constant 2 : index
    %262 = memref.load %arg3[%c10_113, %c2_114] : memref<16x4xf32, #tpu.memory_space<smem>>
    %263 = vector.broadcast %262 : f32 to vector<8x32xf32>
    %264 = arith.mulf %263, %11 : vector<8x32xf32>
    %265 = arith.addf %261, %264 : vector<8x32xf32>
    %c10_115 = arith.constant 10 : index
    %c3_116 = arith.constant 3 : index
    %266 = memref.load %arg3[%c10_115, %c3_116] : memref<16x4xf32, #tpu.memory_space<smem>>
    %267 = vector.broadcast %266 : f32 to vector<8x32xf32>
    %268 = arith.mulf %267, %13 : vector<8x32xf32>
    %269 = arith.addf %265, %268 : vector<8x32xf32>
    %c0_117 = arith.constant 0 : index
    %c10_118 = arith.constant 10 : index
    %270 = memref.load %arg4[%c0_117, %c10_118] : memref<1x16xf32, #tpu.memory_space<smem>>
    %271 = arith.negf %269 : vector<8x32xf32>
    %272 = math.exp %271 : vector<8x32xf32>
    %cst_119 = arith.constant 1.000000e+00 : f32
    %273 = vector.broadcast %cst_119 : f32 to vector<8x32xf32>
    %274 = arith.addf %273, %272 : vector<8x32xf32>
    %275 = arith.divf %273, %274 : vector<8x32xf32>
    %276 = vector.broadcast %270 : f32 to vector<8x32xf32>
    %277 = arith.mulf %276, %275 : vector<8x32xf32>
    %278 = arith.addf %254, %277 : vector<8x32xf32>
    %c11 = arith.constant 11 : index
    %c0_120 = arith.constant 0 : index
    %279 = memref.load %arg3[%c11, %c0_120] : memref<16x4xf32, #tpu.memory_space<smem>>
    %280 = vector.broadcast %279 : f32 to vector<8x32xf32>
    %281 = arith.mulf %280, %7 : vector<8x32xf32>
    %c11_121 = arith.constant 11 : index
    %c1_122 = arith.constant 1 : index
    %282 = memref.load %arg3[%c11_121, %c1_122] : memref<16x4xf32, #tpu.memory_space<smem>>
    %283 = vector.broadcast %282 : f32 to vector<8x32xf32>
    %284 = arith.mulf %283, %9 : vector<8x32xf32>
    %285 = arith.addf %281, %284 : vector<8x32xf32>
    %c11_123 = arith.constant 11 : index
    %c2_124 = arith.constant 2 : index
    %286 = memref.load %arg3[%c11_123, %c2_124] : memref<16x4xf32, #tpu.memory_space<smem>>
    %287 = vector.broadcast %286 : f32 to vector<8x32xf32>
    %288 = arith.mulf %287, %11 : vector<8x32xf32>
    %289 = arith.addf %285, %288 : vector<8x32xf32>
    %c11_125 = arith.constant 11 : index
    %c3_126 = arith.constant 3 : index
    %290 = memref.load %arg3[%c11_125, %c3_126] : memref<16x4xf32, #tpu.memory_space<smem>>
    %291 = vector.broadcast %290 : f32 to vector<8x32xf32>
    %292 = arith.mulf %291, %13 : vector<8x32xf32>
    %293 = arith.addf %289, %292 : vector<8x32xf32>
    %c0_127 = arith.constant 0 : index
    %c11_128 = arith.constant 11 : index
    %294 = memref.load %arg4[%c0_127, %c11_128] : memref<1x16xf32, #tpu.memory_space<smem>>
    %295 = arith.negf %293 : vector<8x32xf32>
    %296 = math.exp %295 : vector<8x32xf32>
    %cst_129 = arith.constant 1.000000e+00 : f32
    %297 = vector.broadcast %cst_129 : f32 to vector<8x32xf32>
    %298 = arith.addf %297, %296 : vector<8x32xf32>
    %299 = arith.divf %297, %298 : vector<8x32xf32>
    %300 = vector.broadcast %294 : f32 to vector<8x32xf32>
    %301 = arith.mulf %300, %299 : vector<8x32xf32>
    %302 = arith.addf %278, %301 : vector<8x32xf32>
    %c12 = arith.constant 12 : index
    %c0_130 = arith.constant 0 : index
    %303 = memref.load %arg3[%c12, %c0_130] : memref<16x4xf32, #tpu.memory_space<smem>>
    %304 = vector.broadcast %303 : f32 to vector<8x32xf32>
    %305 = arith.mulf %304, %7 : vector<8x32xf32>
    %c12_131 = arith.constant 12 : index
    %c1_132 = arith.constant 1 : index
    %306 = memref.load %arg3[%c12_131, %c1_132] : memref<16x4xf32, #tpu.memory_space<smem>>
    %307 = vector.broadcast %306 : f32 to vector<8x32xf32>
    %308 = arith.mulf %307, %9 : vector<8x32xf32>
    %309 = arith.addf %305, %308 : vector<8x32xf32>
    %c12_133 = arith.constant 12 : index
    %c2_134 = arith.constant 2 : index
    %310 = memref.load %arg3[%c12_133, %c2_134] : memref<16x4xf32, #tpu.memory_space<smem>>
    %311 = vector.broadcast %310 : f32 to vector<8x32xf32>
    %312 = arith.mulf %311, %11 : vector<8x32xf32>
    %313 = arith.addf %309, %312 : vector<8x32xf32>
    %c12_135 = arith.constant 12 : index
    %c3_136 = arith.constant 3 : index
    %314 = memref.load %arg3[%c12_135, %c3_136] : memref<16x4xf32, #tpu.memory_space<smem>>
    %315 = vector.broadcast %314 : f32 to vector<8x32xf32>
    %316 = arith.mulf %315, %13 : vector<8x32xf32>
    %317 = arith.addf %313, %316 : vector<8x32xf32>
    %c0_137 = arith.constant 0 : index
    %c12_138 = arith.constant 12 : index
    %318 = memref.load %arg4[%c0_137, %c12_138] : memref<1x16xf32, #tpu.memory_space<smem>>
    %319 = arith.negf %317 : vector<8x32xf32>
    %320 = math.exp %319 : vector<8x32xf32>
    %cst_139 = arith.constant 1.000000e+00 : f32
    %321 = vector.broadcast %cst_139 : f32 to vector<8x32xf32>
    %322 = arith.addf %321, %320 : vector<8x32xf32>
    %323 = arith.divf %321, %322 : vector<8x32xf32>
    %324 = vector.broadcast %318 : f32 to vector<8x32xf32>
    %325 = arith.mulf %324, %323 : vector<8x32xf32>
    %326 = arith.addf %302, %325 : vector<8x32xf32>
    %c13 = arith.constant 13 : index
    %c0_140 = arith.constant 0 : index
    %327 = memref.load %arg3[%c13, %c0_140] : memref<16x4xf32, #tpu.memory_space<smem>>
    %328 = vector.broadcast %327 : f32 to vector<8x32xf32>
    %329 = arith.mulf %328, %7 : vector<8x32xf32>
    %c13_141 = arith.constant 13 : index
    %c1_142 = arith.constant 1 : index
    %330 = memref.load %arg3[%c13_141, %c1_142] : memref<16x4xf32, #tpu.memory_space<smem>>
    %331 = vector.broadcast %330 : f32 to vector<8x32xf32>
    %332 = arith.mulf %331, %9 : vector<8x32xf32>
    %333 = arith.addf %329, %332 : vector<8x32xf32>
    %c13_143 = arith.constant 13 : index
    %c2_144 = arith.constant 2 : index
    %334 = memref.load %arg3[%c13_143, %c2_144] : memref<16x4xf32, #tpu.memory_space<smem>>
    %335 = vector.broadcast %334 : f32 to vector<8x32xf32>
    %336 = arith.mulf %335, %11 : vector<8x32xf32>
    %337 = arith.addf %333, %336 : vector<8x32xf32>
    %c13_145 = arith.constant 13 : index
    %c3_146 = arith.constant 3 : index
    %338 = memref.load %arg3[%c13_145, %c3_146] : memref<16x4xf32, #tpu.memory_space<smem>>
    %339 = vector.broadcast %338 : f32 to vector<8x32xf32>
    %340 = arith.mulf %339, %13 : vector<8x32xf32>
    %341 = arith.addf %337, %340 : vector<8x32xf32>
    %c0_147 = arith.constant 0 : index
    %c13_148 = arith.constant 13 : index
    %342 = memref.load %arg4[%c0_147, %c13_148] : memref<1x16xf32, #tpu.memory_space<smem>>
    %343 = arith.negf %341 : vector<8x32xf32>
    %344 = math.exp %343 : vector<8x32xf32>
    %cst_149 = arith.constant 1.000000e+00 : f32
    %345 = vector.broadcast %cst_149 : f32 to vector<8x32xf32>
    %346 = arith.addf %345, %344 : vector<8x32xf32>
    %347 = arith.divf %345, %346 : vector<8x32xf32>
    %348 = vector.broadcast %342 : f32 to vector<8x32xf32>
    %349 = arith.mulf %348, %347 : vector<8x32xf32>
    %350 = arith.addf %326, %349 : vector<8x32xf32>
    %c14 = arith.constant 14 : index
    %c0_150 = arith.constant 0 : index
    %351 = memref.load %arg3[%c14, %c0_150] : memref<16x4xf32, #tpu.memory_space<smem>>
    %352 = vector.broadcast %351 : f32 to vector<8x32xf32>
    %353 = arith.mulf %352, %7 : vector<8x32xf32>
    %c14_151 = arith.constant 14 : index
    %c1_152 = arith.constant 1 : index
    %354 = memref.load %arg3[%c14_151, %c1_152] : memref<16x4xf32, #tpu.memory_space<smem>>
    %355 = vector.broadcast %354 : f32 to vector<8x32xf32>
    %356 = arith.mulf %355, %9 : vector<8x32xf32>
    %357 = arith.addf %353, %356 : vector<8x32xf32>
    %c14_153 = arith.constant 14 : index
    %c2_154 = arith.constant 2 : index
    %358 = memref.load %arg3[%c14_153, %c2_154] : memref<16x4xf32, #tpu.memory_space<smem>>
    %359 = vector.broadcast %358 : f32 to vector<8x32xf32>
    %360 = arith.mulf %359, %11 : vector<8x32xf32>
    %361 = arith.addf %357, %360 : vector<8x32xf32>
    %c14_155 = arith.constant 14 : index
    %c3_156 = arith.constant 3 : index
    %362 = memref.load %arg3[%c14_155, %c3_156] : memref<16x4xf32, #tpu.memory_space<smem>>
    %363 = vector.broadcast %362 : f32 to vector<8x32xf32>
    %364 = arith.mulf %363, %13 : vector<8x32xf32>
    %365 = arith.addf %361, %364 : vector<8x32xf32>
    %c0_157 = arith.constant 0 : index
    %c14_158 = arith.constant 14 : index
    %366 = memref.load %arg4[%c0_157, %c14_158] : memref<1x16xf32, #tpu.memory_space<smem>>
    %367 = arith.negf %365 : vector<8x32xf32>
    %368 = math.exp %367 : vector<8x32xf32>
    %cst_159 = arith.constant 1.000000e+00 : f32
    %369 = vector.broadcast %cst_159 : f32 to vector<8x32xf32>
    %370 = arith.addf %369, %368 : vector<8x32xf32>
    %371 = arith.divf %369, %370 : vector<8x32xf32>
    %372 = vector.broadcast %366 : f32 to vector<8x32xf32>
    %373 = arith.mulf %372, %371 : vector<8x32xf32>
    %374 = arith.addf %350, %373 : vector<8x32xf32>
    %c15 = arith.constant 15 : index
    %c0_160 = arith.constant 0 : index
    %375 = memref.load %arg3[%c15, %c0_160] : memref<16x4xf32, #tpu.memory_space<smem>>
    %376 = vector.broadcast %375 : f32 to vector<8x32xf32>
    %377 = arith.mulf %376, %7 : vector<8x32xf32>
    %c15_161 = arith.constant 15 : index
    %c1_162 = arith.constant 1 : index
    %378 = memref.load %arg3[%c15_161, %c1_162] : memref<16x4xf32, #tpu.memory_space<smem>>
    %379 = vector.broadcast %378 : f32 to vector<8x32xf32>
    %380 = arith.mulf %379, %9 : vector<8x32xf32>
    %381 = arith.addf %377, %380 : vector<8x32xf32>
    %c15_163 = arith.constant 15 : index
    %c2_164 = arith.constant 2 : index
    %382 = memref.load %arg3[%c15_163, %c2_164] : memref<16x4xf32, #tpu.memory_space<smem>>
    %383 = vector.broadcast %382 : f32 to vector<8x32xf32>
    %384 = arith.mulf %383, %11 : vector<8x32xf32>
    %385 = arith.addf %381, %384 : vector<8x32xf32>
    %c15_165 = arith.constant 15 : index
    %c3_166 = arith.constant 3 : index
    %386 = memref.load %arg3[%c15_165, %c3_166] : memref<16x4xf32, #tpu.memory_space<smem>>
    %387 = vector.broadcast %386 : f32 to vector<8x32xf32>
    %388 = arith.mulf %387, %13 : vector<8x32xf32>
    %389 = arith.addf %385, %388 : vector<8x32xf32>
    %c0_167 = arith.constant 0 : index
    %c15_168 = arith.constant 15 : index
    %390 = memref.load %arg4[%c0_167, %c15_168] : memref<1x16xf32, #tpu.memory_space<smem>>
    %391 = arith.negf %389 : vector<8x32xf32>
    %392 = math.exp %391 : vector<8x32xf32>
    %cst_169 = arith.constant 1.000000e+00 : f32
    %393 = vector.broadcast %cst_169 : f32 to vector<8x32xf32>
    %394 = arith.addf %393, %392 : vector<8x32xf32>
    %395 = arith.divf %393, %394 : vector<8x32xf32>
    %396 = vector.broadcast %390 : f32 to vector<8x32xf32>
    %397 = arith.mulf %396, %395 : vector<8x32xf32>
    %398 = arith.addf %374, %397 : vector<8x32xf32>
    %399 = arith.negf %398 : vector<8x32xf32>
    %400 = math.exp %399 : vector<8x32xf32>
    %cst_170 = arith.constant 1.000000e+00 : f32
    %401 = vector.broadcast %cst_170 : f32 to vector<8x32xf32>
    %402 = arith.addf %401, %400 : vector<8x32xf32>
    %403 = arith.divf %401, %402 : vector<8x32xf32>
    %404 = arith.truncf %403 : vector<8x32xf32> to vector<8x32xbf16>
    %cst_171 = arith.constant dense<0.000000e+00> : vector<8x128xf32>
    %405 = tpu.matmul %404, %4, %cst_171 {dimension_numbers = #tpu.dot_dimension_numbers<[1], [0], [0], [1], [0, 0, 1, 1], [], []>} : vector<8x32xbf16>, vector<32x128xbf16>, vector<8x128xf32> -> vector<8x128xf32>
    %cst_172 = arith.constant 1.000000e+00 : f32
    %406 = vector.broadcast %cst_172 : f32 to vector<8x128xf32>
    %407 = arith.mulf %405, %406 : vector<8x128xf32>
    %408 = tpu.iota {dimensions = array<i32: 1>} : vector<8x128xi32>
    %c100_i32 = arith.constant 100 : i32
    %409 = vector.broadcast %c100_i32 : i32 to vector<8x128xi32>
    %410 = arith.cmpi slt, %408, %409 : vector<8x128xi32>
    %cst_173 = arith.constant 0xFF800000 : f32
    %411 = vector.broadcast %cst_173 : f32 to vector<8x128xf32>
    %412 = arith.select %410, %407, %411 : vector<8x128xi1>, vector<8x128xf32>
    %cst_174 = arith.constant dense<0xFF800000> : vector<8xf32>
    %413 = vector.multi_reduction <maximumf>, %412, %cst_174 [1] : vector<8x128xf32> to vector<8xf32>
    %414 = vector.shape_cast %413 : vector<8xf32> to vector<8x1xf32>
    %415 = vector.broadcast %414 : vector<8x1xf32> to vector<8x128xf32>
    %416 = arith.subf %412, %415 : vector<8x128xf32>
    %417 = math.exp %416 : vector<8x128xf32>
    %cst_175 = arith.constant dense<0.000000e+00> : vector<8xf32>
    %418 = vector.multi_reduction <add>, %417, %cst_175 [1] : vector<8x128xf32> to vector<8xf32>
    %419 = vector.shape_cast %418 : vector<8xf32> to vector<8x1xf32>
    %420 = vector.broadcast %419 : vector<8x1xf32> to vector<8x128xf32>
    %421 = arith.divf %417, %420 : vector<8x128xf32>
    %422 = arith.index_cast %5 : i32 to index
    %c0_176 = arith.constant 0 : index
    %423 = vector.load %arg6[%422, %c0_176] : memref<8x128xf32, #tpu.memory_space<vmem>>, vector<8x128xf32>
    tpu.vector_store %arg6[%422, %c0_176], %421 {strides = array<i32>} : memref<8x128xf32, #tpu.memory_space<vmem>>, vector<8x128xf32>,
    return
  }
  func.func @transform_0(%arg0: i32) -> (i32, i32) {
    %c0_i32 = arith.constant 0 : i32
    %c0_i32_0 = arith.constant 0 : i32
    return %arg0, %c0_i32 : i32, i32
  }
  func.func @transform_1(%arg0: i32) -> (i32, i32) {
    %c0_i32 = arith.constant 0 : i32
    %c0_i32_0 = arith.constant 0 : i32
    %c0_i32_1 = arith.constant 0 : i32
    return %c0_i32, %c0_i32_0 : i32, i32
  }
  func.func @transform_2(%arg0: i32) -> (i32, i32) {
    %c0_i32 = arith.constant 0 : i32
    %c0_i32_0 = arith.constant 0 : i32
    %c0_i32_1 = arith.constant 0 : i32
    return %c0_i32, %c0_i32_0 : i32, i32
  }
  func.func @transform_3(%arg0: i32) -> (i32, i32) {
    %c0_i32 = arith.constant 0 : i32
    %c0_i32_0 = arith.constant 0 : i32
    %c0_i32_1 = arith.constant 0 : i32
    return %c0_i32, %c0_i32_0 : i32, i32
  }
  func.func @transform_4(%arg0: i32) -> (i32, i32) {
    %c0_i32 = arith.constant 0 : i32
    %c0_i32_0 = arith.constant 0 : i32
    %c0_i32_1 = arith.constant 0 : i32
    return %c0_i32, %c0_i32_0 : i32, i32
  }
  func.func @transform_5(%arg0: i32) -> (i32, i32) {
    %c0_i32 = arith.constant 0 : i32
    %c0_i32_0 = arith.constant 0 : i32
    return %arg0, %c0_i32 : i32, i32
  }
  func.func @transform_6(%arg0: i32) -> (i32, i32) {
    %c0_i32 = arith.constant 0 : i32
    %c0_i32_0 = arith.constant 0 : i32
    return %arg0, %c0_i32 : i32, i32
  }
}

</mosaic_0001>

<bundles_post_ra>
// kernel: informed_sender_forward.1
= control target key start
LH: loop header
LB: loop body
LE: loop exit
PB: predicated region body
PF: predicated region fallthrough
CT: control target
= control target key end

     0   :  { %12 = vsyncpa [#allocation3], 0  ;;  %s1363_s0 = inlined_call_operand.vmem [shape: bf16[8,64], index: 0, kind: input, shape index: {}]   ;;  %s1364_s1 = inlined_call_operand.vmem [shape: bf16[64,128], index: 1, kind: input, shape index: {}]   ;;  %s1365_s2 = inlined_call_operand.vmem [shape: f32[16,4], index: 2, kind: input, shape index: {}]   ;;  %s1366_s3 = inlined_call_operand.vmem [shape: f32[1,16], index: 3, kind: input, shape index: {}]   ;;  %s1367_s4 = inlined_call_operand.vmem [shape: bf16[32,128], index: 4, kind: input, shape index: {}]   ;;  %s1368_s5 = inlined_call_operand.vmem [shape: f32[8,128], index: 5, kind: output, shape index: {0}]   ;;  %s1369_s6 = inlined_call_operand.vmem [shape: f32[8,128], index: 6, kind: output, shape index: {1}]  }
   0x1   :  { %s23_s23 = sshll.u32 %s1365_s2, 4  ;;  %s24_s23 = int_to_ptr.vmem [resolvable:$true] %s23_s23 }
   0x2   :  { %13 = vsyncpa [#allocation5], 0  ;;  %s36_s26 = sshll.u32 %s1366_s3, 4  ;;  %s1030_s27 = scalar_lea.vmem %s24_s23, 256  ;;  %s37_s26 = int_to_ptr.vmem [resolvable:$true] %s36_s26 }
   0x3   :  { %p1031_p0 = scmp.ne.s32.totalorder %s24_s23, %s1030_s27  ;;  %p1035_p1 = scmp.lt.s32.totalorder %s24_s23, %s24_s23 }
   0x4   :  { %p1036_p2 = scmp.lt.s32.totalorder %s1030_s27, %s1030_s27 }
   0x6   :  { %p1037_p3 = por %p1036_p2, %p1035_p1 }
   0x8   :  { %p1038_p4 = pnand %p1037_p3, %p1031_p0 }
   0xa   :  { %1041 = shalt.err (!%p1038_p4)
}
   0xb   :  { %s1058_s28 = smov [#allocation2]   ;;  %s1059_s29 = smov 128  }
   0xc   :  { %s1060_s30 = smov 8   ;;  %s1042_s7 = scalar_lea.vmem %s37_s26, 16 }
   0xd   :  { %29 = dma.vmem_to_smem %s24_s23, 256, %s1058_s28, [#allocation3], %s1059_s29, %s1059_s29, %s1060_s30  }
   0xe   :  { %p1043_p5 = scmp.ne.s32.totalorder %s37_s26, %s1042_s7  ;;  %p1047_p6 = scmp.lt.s32.totalorder %s37_s26, %s37_s26 }
   0xf   :  { %p1048_p7 = scmp.lt.s32.totalorder %s1042_s7, %s1042_s7 }
  0x11   :  { %p1049_p8 = por %p1048_p7, %p1047_p6 }
  0x13   :  { %p1050_p9 = pnand %p1049_p8, %p1043_p5 }
  0x15   :  { %1053 = shalt.err (!%p1050_p9)
}
  0x16   :  { %s1061_s2 = smov [#allocation4]  }
  0x17   :  { %39 = dma.vmem_to_smem %s37_s26, 16, %s1061_s2, [#allocation5]  }
  0x18   :  { %1054 = dma.done.wait [#allocation3], 256  }
  0x19   :  { %1055 = vsyncadd [#allocation3], 4294967040 }
  0x1a   :  { %1056 = dma.done.wait [#allocation5], 16  }
  0x1b   :  { %1057 = vsyncadd [#allocation5], 4294967280 }
  0x1c   :  { %48 = sfence }
  0x1d   :  { %v952_v0 = vld [vmem:[%s1364_s1] sm:$0xff]   ;;  %v1062_v1 = vmov 0.0   ;;  %v953_v2 = vld [vmem:[%s1364_s1 + $0x8] sm:$0xff]   ;;  %vm1063_vm0 = vmmov 0   ;;  %v954_v3 = vld [vmem:[%s1364_s1 + $0x10] sm:$0xff]   ;;  %vm83_vm1 = vcmask 523264  }
  0x1e   :  { %923 = vmatprep.subr.bf16.mxu0 %v1062_v1  ;;  %935 = vmatprep.subr.bf16.mxu1 %v1062_v1  ;;  %v955_v4 = vld [vmem:[%s1364_s1 + $0x18] sm:$0xff]   ;;  %v50_v5 = vld [vmem:[%s1363_s0] sm:$0xf]  ;;  %s818_s17 = sld [smem:[#allocation2 + $0x2]]  ;;  %s817_s18 = sld [smem:[#allocation2 + $0x1]]  ;;  %vm744_vm2 = vcmask 261120  }
  0x1f   :  { %924 = vmatpush3.bf16.msra.mxu0 %v952_v0  ;;  %931 = vmatprep.mubr.msk.bf16.mxu0 %vm1063_vm0, %v1062_v1  ;;  %s823_s19 = sld [smem:[#allocation2 + $0x82]]  ;;  %s822_s20 = sld [smem:[#allocation2 + $0x81]] }
  0x20   :  { %925 = vmatprep.subr.bf16.mxu0 %v1062_v1  ;;  %939 = vmatprep.mubr.msk.bf16.mxu1 %vm1063_vm0, %v1062_v1  ;;  %s819_s21 = sld [smem:[#allocation2 + $0x3]]  ;;  %s828_s22 = sld [smem:[#allocation2 + $0x101]] }
  0x21   :  { %s829_s0 = sld [smem:[#allocation2 + $0x102]]  ;;  %s824_s24 = sld [smem:[#allocation2 + $0x83]] }
  0x22   :  { %s1064_s25 = smov 64   ;;  %s1065_s26 = smov 96  }
  0x23   :  { %926 = vmatpush3.bf16.msra.mxu0 %v953_v2  ;;  %s834_s27 = sld [smem:[#allocation2 + $0x181]]  ;;  %s835_s29 = sld [smem:[#allocation2 + $0x182]] }
  0x24   :  { %927 = vmatprep.subr.bf16.mxu0 %v1062_v1  ;;  %v145_v6 = vstv %s818_s17  ;;  %v137_v7 = vstv %s817_s18  ;;  %s840_s28 = sld [smem:[#allocation2 + $0x201]]  ;;  %s1066_s30 = smov 32  }
  0x25   :  { %v182_v13 = vstv %s823_s19  ;;  %v174_v14 = vstv %s822_s20  ;;  %s841_s7 = sld [smem:[#allocation2 + $0x202]]  ;;  %s836_s2 = sld [smem:[#allocation2 + $0x183]] }
  0x26   :  { %v153_v18 = vstv %s819_s21  ;;  %v211_v19 = vstv %s828_s22  ;;  %s842_s3 = sld [smem:[#allocation2 + $0x203]]  ;;  %s846_s8 = sld [smem:[#allocation2 + $0x281]] }
  0x27   :  { %928 = vmatpush3.bf16.msra.mxu0 %v954_v3  ;;  %v219_v22 = vstv %s829_s0  ;;  %v190_v23 = vstv %s824_s24  ;;  %s852_s9 = sld [smem:[#allocation2 + $0x301]]  ;;  %s847_s10 = sld [smem:[#allocation2 + $0x282]] }
  0x28   :  { %929 = vmatprep.subr.bf16.mxu0 %v1062_v1  ;;  %s853_s11 = sld [smem:[#allocation2 + $0x302]]  ;;  %s848_s12 = sld [smem:[#allocation2 + $0x283]] }
  0x29   :  { %v248_v27 = vstv %s834_s27  ;;  %v256_v31 = vstv %s835_s29  ;;  %s854_s13 = sld [smem:[#allocation2 + $0x303]]  ;;  %s858_s14 = sld [smem:[#allocation2 + $0x381]] }
  0x2a   :  { %v285_v30 = vstv %s840_s28  ;;  %s864_s15 = sld [smem:[#allocation2 + $0x401]]  ;;  %s859_s16 = sld [smem:[#allocation2 + $0x382]] }
  0x2b   :  { %930 = vmatpush3.bf16.msra.mxu0 %v955_v4  ;;  %v293_v34 = vstv %s841_s7  ;;  %v264_v35 = vstv %s836_s2  ;;  %s865_s17 = sld [smem:[#allocation2 + $0x402]]  ;;  %s860_s18 = sld [smem:[#allocation2 + $0x383]] }
  0x2c   :  { %v301_v38 = vstv %s842_s3  ;;  %v322_v39 = vstv %s846_s8  ;;  %s866_s19 = sld [smem:[#allocation2 + $0x403]]  ;;  %s870_s20 = sld [smem:[#allocation2 + $0x481]] }
  0x2d   :  { %v359_v42 = vstv %s852_s9  ;;  %v330_v43 = vstv %s847_s10  ;;  %s876_s21 = sld [smem:[#allocation2 + $0x501]]  ;;  %s871_s22 = sld [smem:[#allocation2 + $0x482]] }
  0x2e   :  { %932 = vmatmul.mubr.msk.bf16.vlgmr.msra.gmra.mrb[0].mxu0 %vm83_vm1, %v50_v5  ;;  %v367_v46 = vstv %s853_s11  ;;  %v338_v47 = vstv %s848_s12  ;;  %s877_s1 = sld [smem:[#allocation2 + $0x502]]  ;;  %s872_s23 = sld [smem:[#allocation2 + $0x483]] }
  0x2f   :  { %v375_v50 = vstv %s854_s13  ;;  %v396_v51 = vstv %s858_s14  ;;  %s878_s0 = sld [smem:[#allocation2 + $0x503]]  ;;  %s882_s24 = sld [smem:[#allocation2 + $0x581]] }
  0x30   :  { %v433_v54 = vstv %s864_s15  ;;  %v404_v55 = vstv %s859_s16  ;;  %s883_s27 = sld [smem:[#allocation2 + $0x582]]  ;;  %s884_s29 = sld [smem:[#allocation2 + $0x583]] }
  0x31   :  { %v441_v58 = vstv %s865_s17  ;;  %v412_v59 = vstv %s860_s18  ;;  %s889_s28 = sld [smem:[#allocation2 + $0x602]]  ;;  %s890_s7 = sld [smem:[#allocation2 + $0x603]] }
  0x32   :  { %v449_v62 = vstv %s866_s19  ;;  %v470_v63 = vstv %s870_s20  ;;  %s894_s2 = sld [smem:[#allocation2 + $0x681]]  ;;  %s895_s8 = sld [smem:[#allocation2 + $0x682]] }
  0x33   :  { %v507_v3 = vstv %s876_s21  ;;  %v478_v4 = vstv %s871_s22  ;;  %s900_s3 = sld [smem:[#allocation2 + $0x701]]  ;;  %s901_s9 = sld [smem:[#allocation2 + $0x702]] }
  0x34   :  { %s896_s10 = sld [smem:[#allocation2 + $0x683]]  ;;  %s906_s12 = sld [smem:[#allocation2 + $0x781]] }
  0x35   :  { %s902_s11 = sld [smem:[#allocation2 + $0x703]]  ;;  %s907_s14 = sld [smem:[#allocation2 + $0x782]] }
  0x36   :  { %s908_s13 = sld [smem:[#allocation2 + $0x783]]  ;;  %s1249_s19 = sld [smem:[#allocation2 + $0x200]] }
  0x37   :  { %s1251_s20 = sld [smem:[#allocation2 + $0x280]]  ;;  %s1348_s15 = sld [smem:[#allocation4 + $0xa]] }
  0x38   :  { %s1258_s21 = sld [smem:[#allocation2 + $0x300]]  ;;  %s1351_s16 = sld [smem:[#allocation4 + $0xb]] }
  0x39   :  { %s1265_s22 = sld [smem:[#allocation2 + $0x380]]  ;;  %s1354_s17 = sld [smem:[#allocation4 + $0xc]] }
  0x3a   :  { %s897_s18 = sld [smem:[#allocation4 + $0xd]] }
 0x101   :  { %v1130_v8 = vpop.f32.mrb[0].mxu0 }
 0x102   :  { %127 = vst [vmem:[%s1369_s6] sm:$0xff] %v1130_v8  ;;  %v933_v9 = vpop.f32.mrb[1].mxu0  ;;  %v146_v10 = vmul.f32 %v145_v6, %v1130_v8  ;;  %v138_v11 = vmul.f32 %v137_v7, %v1130_v8  ;;  %v183_v16 = vmul.f32 %v182_v13, %v1130_v8  ;;  %v175_v17 = vmul.f32 %v174_v14, %v1130_v8  ;;  %s830_s6 = sld [smem:[#allocation2 + $0x103]] }
 0x103   :  { %v124_v12 = vpop.f32.mrb[2].mxu0  ;;  %v154_v20 = vmul.f32 %v153_v18, %v1130_v8  ;;  %v212_v21 = vmul.f32 %v211_v19, %v1130_v8  ;;  %v220_v24 = vmul.f32 %v219_v22, %v1130_v8  ;;  %v191_v25 = vmul.f32 %v190_v23, %v1130_v8 }
 0x104   :  { %v934_v15 = vpop.f32.mrb[3].mxu0  ;;  %148 = vrot.lane.b32.xlu1 %v146_v10, %s1064_s25  ;;  %140 = vrot.lane.b32.xlu0 %v138_v11, %s1065_s26  ;;  %v249_v29 = vmul.f32 %v248_v27, %v1130_v8  ;;  %v286_v32 = vmul.f32 %v285_v30, %v1130_v8  ;;  %v257_v33 = vmul.f32 %v256_v31, %v1130_v8  ;;  %v515_v7 = vstv %s877_s1  ;;  %s1270_s1 = sld [smem:[#allocation2 + $0x400]] }
 0x105   :  { %v294_v36 = vmul.f32 %v293_v34, %v1130_v8  ;;  %v265_v37 = vmul.f32 %v264_v35, %v1130_v8  ;;  %v302_v40 = vmul.f32 %v301_v38, %v1130_v8  ;;  %v323_v41 = vmul.f32 %v322_v39, %v1130_v8 }
 0x106   :  { %v360_v44 = vmul.f32 %v359_v42, %v1130_v8  ;;  %v331_v45 = vmul.f32 %v330_v43, %v1130_v8  ;;  %v368_v48 = vmul.f32 %v367_v46, %v1130_v8  ;;  %v339_v49 = vmul.f32 %v338_v47, %v1130_v8 }
 0x107   :  { %v376_v52 = vmul.f32 %v375_v50, %v1130_v8  ;;  %v397_v53 = vmul.f32 %v396_v51, %v1130_v8  ;;  %v434_v56 = vmul.f32 %v433_v54, %v1130_v8  ;;  %v405_v57 = vmul.f32 %v404_v55, %v1130_v8 }
 0x108   :  { %185 = vrot.lane.b32.xlu1 %v183_v16, %s1064_s25  ;;  %177 = vrot.lane.b32.xlu0 %v175_v17, %s1065_s26  ;;  %v227_v26 = vstv %s830_s6  ;;  %v442_v60 = vmul.f32 %v441_v58, %v1130_v8  ;;  %v413_v61 = vmul.f32 %v412_v59, %v1130_v8  ;;  %v450_v0 = vmul.f32 %v449_v62, %v1130_v8  ;;  %s888_s6 = sld [smem:[#allocation2 + $0x601]] }
 0x109   :  { %v228_v28 = vmul.f32 %v227_v26, %v1130_v8  ;;  %v471_v2 = vmul.f32 %v470_v63, %v1130_v8  ;;  %v508_v5 = vmul.f32 %v507_v3, %v1130_v8  ;;  %v479_v6 = vmul.f32 %v478_v4, %v1130_v8 }
 0x10a   :  { %v486_v9 = vstv %s872_s23  ;;  %v516_v10 = vmul.f32 %v515_v7, %v1130_v8  ;;  %v523_v12 = vstv %s878_s0  ;;  %v544_v13 = vstv %s882_s24  ;;  %s1274_s23 = sld [smem:[#allocation2 + $0x480]] }
 0x10b   :  { %v487_v11 = vmul.f32 %v486_v9, %v1130_v8  ;;  %v524_v14 = vmul.f32 %v523_v12, %v1130_v8  ;;  %v545_v15 = vmul.f32 %v544_v13, %v1130_v8  ;;  %v552_v17 = vstv %s883_s27  ;;  %s1278_s0 = sld [smem:[#allocation2 + $0x500]] }
 0x10c   :  { %156 = vrot.lane.b32.xlu1 %v154_v20, %s1066_s30  ;;  %214 = vrot.lane.b32.xlu0 %v212_v21, %s1065_s26  ;;  %v553_v19 = vmul.f32 %v552_v17, %v1130_v8  ;;  %v589_v20 = vstv %s889_s28  ;;  %v560_v21 = vstv %s884_s29  ;;  %s1282_s24 = sld [smem:[#allocation2 + $0x580]] }
 0x10d   :  { %v590_v22 = vmul.f32 %v589_v20, %v1130_v8  ;;  %v561_v23 = vmul.f32 %v560_v21, %v1130_v8  ;;  %v319_v20 = vstv %s1251_s20  ;;  %s1307_s27 = sld [smem:[#allocation2 + $0x680]] }
 0x10e   :  { %v581_v16 = vstv %s888_s6  ;;  %s1286_s6 = sld [smem:[#allocation2 + $0x600]] }
 0x10f   :  { %v582_v18 = vmul.f32 %v581_v16, %v1130_v8  ;;  %s1311_s28 = sld [smem:[#allocation2 + $0x700]] }
 0x110   :  { %222 = vrot.lane.b32.xlu1 %v220_v24, %s1064_s25  ;;  %193 = vrot.lane.b32.xlu0 %v191_v25, %s1066_s30  ;;  %v597_v24 = vstv %s890_s7  ;;  %v618_v25 = vstv %s894_s2  ;;  %s1314_s29 = sld [smem:[#allocation2 + $0x780]]  ;;  %s1318_s7 = sld [smem:[#allocation4 + $0x1]] }
 0x111   :  { %v598_v26 = vmul.f32 %v597_v24, %v1130_v8  ;;  %v619_v27 = vmul.f32 %v618_v25, %v1130_v8  ;;  %s1321_s2 = sld [smem:[#allocation4]] }
 0x114   :  { %230 = vrot.lane.b32.xlu1 %v228_v28, %s1066_s30  ;;  %251 = vrot.lane.b32.xlu0 %v249_v29, %s1065_s26  ;;  %v655_v28 = vstv %s900_s3  ;;  %v626_v29 = vstv %s895_s8  ;;  %s1323_s3 = sld [smem:[#allocation4 + $0x2]]  ;;  %s1325_s8 = sld [smem:[#allocation4 + $0x3]] }
 0x115   :  { %v656_v30 = vmul.f32 %v655_v28, %v1130_v8  ;;  %v627_v31 = vmul.f32 %v626_v29, %v1130_v8 }
 0x118   :  { %288 = vrot.lane.b32.xlu1 %v286_v32, %s1065_s26  ;;  %259 = vrot.lane.b32.xlu0 %v257_v33, %s1064_s25  ;;  %v663_v32 = vstv %s901_s9  ;;  %v634_v33 = vstv %s896_s10  ;;  %s1328_s9 = sld [smem:[#allocation4 + $0x4]]  ;;  %s1332_s10 = sld [smem:[#allocation4 + $0x5]] }
 0x119   :  { %v664_v34 = vmul.f32 %v663_v32, %v1130_v8  ;;  %v635_v35 = vmul.f32 %v634_v33, %v1130_v8  ;;  %v320_v32 = vmul.f32 %v319_v20, %v1130_v8 }
 0x11c   :  { %296 = vrot.lane.b32.xlu1 %v294_v36, %s1064_s25  ;;  %267 = vrot.lane.b32.xlu0 %v265_v37, %s1066_s30  ;;  %v671_v36 = vstv %s902_s11  ;;  %v692_v37 = vstv %s906_s12  ;;  %s1336_s11 = sld [smem:[#allocation4 + $0x6]]  ;;  %s1339_s12 = sld [smem:[#allocation4 + $0x7]] }
 0x11d   :  { %v672_v38 = vmul.f32 %v671_v36, %v1130_v8  ;;  %v693_v39 = vmul.f32 %v692_v37, %v1130_v8 }
 0x120   :  { %304 = vrot.lane.b32.xlu1 %v302_v40, %s1066_s30  ;;  %325 = vrot.lane.b32.xlu0 %v323_v41, %s1065_s26  ;;  %v708_v40 = vstv %s908_s13  ;;  %v700_v41 = vstv %s907_s14  ;;  %s1342_s13 = sld [smem:[#allocation4 + $0x8]]  ;;  %s1345_s14 = sld [smem:[#allocation4 + $0x9]] }
 0x121   :  { %v709_v42 = vmul.f32 %v708_v40, %v1130_v8  ;;  %v701_v43 = vmul.f32 %v700_v41, %v1130_v8  ;;  %v393_v41 = vstv %s1265_s22 }
 0x124   :  { %362 = vrot.lane.b32.xlu1 %v360_v44, %s1065_s26  ;;  %333 = vrot.lane.b32.xlu0 %v331_v45, %s1064_s25  ;;  %v956_v44 = vld [vmem:[%s1367_s4] sm:$0xff]   ;;  %v957_v45 = vld [vmem:[%s1367_s4 + $0x8] sm:$0xff]   ;;  %s133_s4 = sld [smem:[#allocation2]] }
 0x125   :  { %936 = vmatpush3.bf16.msra.mxu1 %v956_v44 }
 0x126   :  { %937 = vmatprep.subr.bf16.mxu1 %v1062_v1 }
 0x128   :  { %370 = vrot.lane.b32.xlu1 %v368_v48, %s1064_s25  ;;  %341 = vrot.lane.b32.xlu0 %v339_v49, %s1066_s30 }
 0x129   :  { %938 = vmatpush3.bf16.msra.mxu1 %v957_v45 }
 0x12a   :  { %v134_v4 = vstv %s133_s4  ;;  %s903_s4 = sld [smem:[#allocation4 + $0xe]] }
 0x12b   :  { %v135_v9 = vmul.f32 %v134_v4, %v1130_v8 }
 0x12c   :  { %378 = vrot.lane.b32.xlu1 %v376_v52, %s1066_s30  ;;  %399 = vrot.lane.b32.xlu0 %v397_v53, %s1065_s26 }
 0x130   :  { %436 = vrot.lane.b32.xlu1 %v434_v56, %s1065_s26  ;;  %407 = vrot.lane.b32.xlu0 %v405_v57, %s1064_s25 }
 0x134   :  { %444 = vrot.lane.b32.xlu1 %v442_v60, %s1064_s25  ;;  %415 = vrot.lane.b32.xlu0 %v413_v61, %s1066_s30 }
 0x138   :  { %452 = vrot.lane.b32.xlu1 %v450_v0, %s1066_s30  ;;  %473 = vrot.lane.b32.xlu0 %v471_v2, %s1065_s26 }
 0x13c   :  { %510 = vrot.lane.b32.xlu1 %v508_v5, %s1065_s26  ;;  %481 = vrot.lane.b32.xlu0 %v479_v6, %s1064_s25 }
 0x140   :  { %518 = vrot.lane.b32.xlu1 %v516_v10, %s1064_s25  ;;  %489 = vrot.lane.b32.xlu0 %v487_v11, %s1066_s30 }
 0x144   :  { %526 = vrot.lane.b32.xlu1 %v524_v14, %s1066_s30  ;;  %547 = vrot.lane.b32.xlu0 %v545_v15, %s1065_s26 }
 0x148   :  { %584 = vrot.lane.b32.xlu1 %v582_v18, %s1065_s26  ;;  %555 = vrot.lane.b32.xlu0 %v553_v19, %s1064_s25  ;;  %v282_v19 = vstv %s1249_s19 }
 0x14c   :  { %592 = vrot.lane.b32.xlu1 %v590_v22, %s1064_s25  ;;  %563 = vrot.lane.b32.xlu0 %v561_v23, %s1066_s30 }
 0x150   :  { %600 = vrot.lane.b32.xlu1 %v598_v26, %s1066_s30  ;;  %621 = vrot.lane.b32.xlu0 %v619_v27, %s1065_s26  ;;  %v356_v27 = vstv %s1258_s21 }
 0x151   :  { %v357_v40 = vmul.f32 %v356_v27, %v1130_v8 }
 0x154   :  { %658 = vrot.lane.b32.xlu1 %v656_v30, %s1065_s26  ;;  %629 = vrot.lane.b32.xlu0 %v627_v31, %s1064_s25  ;;  %v283_v31 = vmul.f32 %v282_v19, %v1130_v8 }
 0x158   :  { %666 = vrot.lane.b32.xlu1 %v664_v34, %s1064_s25  ;;  %637 = vrot.lane.b32.xlu0 %v635_v35, %s1066_s30 }
 0x15c   :  { %674 = vrot.lane.b32.xlu1 %v672_v38, %s1066_s30  ;;  %695 = vrot.lane.b32.xlu0 %v693_v39, %s1065_s26  ;;  %s827_s26 = sld [smem:[#allocation2 + $0x100]] }
 0x160   :  { %711 = vrot.lane.b32.xlu1 %v709_v42, %s1066_s30  ;;  %703 = vrot.lane.b32.xlu0 %v701_v43, %s1064_s25  ;;  %s821_s25 = sld [smem:[#allocation2 + $0x80]] }
 0x161   :  { %s833_s30 = sld [smem:[#allocation2 + $0x180]] }
 0x162   :  { %v208_v12 = vstv %s827_s26 }
 0x163   :  { %v209_v18 = vmul.f32 %v208_v12, %v1130_v8 }
 0x166   :  { %v171_v5 = vstv %s821_s25  ;;  %s909_s25 = sld [smem:[#allocation4 + $0xf]] }
 0x167   :  { %v172_v11 = vmul.f32 %v171_v5, %v1130_v8  ;;  %v245_v16 = vstv %s833_s30 }
 0x168   :  { %v246_v26 = vmul.f32 %v245_v16, %v1130_v8 }
 0x176   :  { %v149_v46 = vpop.permute.xlu1 %148  ;;  %v141_v47 = vpop.permute.xlu0 %140 }
 0x177   :  { %v143_v10 = vadd.f32 %v141_v47, %v135_v9  ;;  %v430_v47 = vstv %s1270_s1 }
 0x179   :  { %v151_v17 = vadd.f32 %v149_v46, %v143_v10 }
 0x17a   :  { %v186_v48 = vpop.permute.xlu1 %185  ;;  %v178_v49 = vpop.permute.xlu0 %177 }
 0x17b   :  { %v180_v15 = vadd.f32 %v178_v49, %v172_v11  ;;  %v578_v11 = vstv %s1286_s6 }
 0x17c   :  { %v579_v20 = vmul.f32 %v578_v11, %v1130_v8 }
 0x17d   :  { %v188_v25 = vadd.f32 %v186_v48, %v180_v15  ;;  %v467_v48 = vstv %s1274_s23 }
 0x17e   :  { %v157_v50 = vpop.permute.xlu1 %156  ;;  %v215_v51 = vpop.permute.xlu0 %214 }
 0x17f   :  { %v159_v23 = vadd.f32 %v157_v50, %v151_v17  ;;  %v217_v24 = vadd.f32 %v215_v51, %v209_v18 }
 0x181   :  { %v820_v35 = vmul.f32 -1.442695, %v159_v23 }
 0x182   :  { %v223_v52 = vpop.permute.xlu1 %222  ;;  %v194_v53 = vpop.permute.xlu0 %193 }
 0x183   :  { %v225_v28 = vadd.f32 %v223_v52, %v217_v24  ;;  %v196_v29 = vadd.f32 %v194_v53, %v188_v25  ;;  %958 = vpow2.f32 %v820_v35  ;;  %v394_v53 = vmul.f32 %v393_v41, %v1130_v8 }
 0x185   :  { %v826_v42 = vmul.f32 -1.442695, %v196_v29 }
 0x186   :  { %v231_v54 = vpop.permute.xlu1 %230  ;;  %v252_v55 = vpop.permute.xlu0 %251 }
 0x187   :  { %v254_v30 = vadd.f32 %v252_v55, %v246_v26  ;;  %v233_v36 = vadd.f32 %v231_v54, %v225_v28  ;;  %960 = vpow2.f32 %v826_v42 }
 0x189   :  { %v832_v51 = vmul.f32 -1.442695, %v233_v36 }
 0x18a   :  { %v289_v56 = vpop.permute.xlu1 %288  ;;  %v260_v57 = vpop.permute.xlu0 %259 }
 0x18b   :  { %v291_v37 = vadd.f32 %v289_v56, %v283_v31  ;;  %v262_v38 = vadd.f32 %v260_v57, %v254_v30  ;;  %v504_v56 = vstv %s1278_s0  ;;  %962 = vpow2.f32 %v832_v51 }
 0x18c   :  { %v505_v10 = vmul.f32 %v504_v56, %v1130_v8 }
 0x18d   :  { %v959_v23 = vpop.eup %958 }
 0x18e   :  { %v297_v58 = vpop.permute.xlu1 %296  ;;  %v268_v59 = vpop.permute.xlu0 %267  ;;  %v164_v31 = vadd.f32 1.0, %v959_v23 }
 0x18f   :  { %v299_v43 = vadd.f32 %v297_v58, %v291_v37  ;;  %v270_v44 = vadd.f32 %v268_v59, %v262_v38  ;;  %v431_v59 = vmul.f32 %v430_v47, %v1130_v8  ;;  %v615_v38 = vstv %s1307_s27 }
 0x191   :  { %v838_v57 = vmul.f32 -1.442695, %v270_v44  ;;  %v961_v27 = vpop.eup %960 }
 0x192   :  { %v1239_v60 = vpop.permute.xlu1 %304  ;;  %v326_v61 = vpop.permute.xlu0 %325  ;;  %v201_v36 = vadd.f32 1.0, %v961_v27 }
 0x193   :  { %v328_v39 = vadd.f32 %v326_v61, %v320_v32  ;;  %v307_v52 = vadd.f32 %v1239_v60, %v299_v43  ;;  %v541_v60 = vstv %s1282_s24  ;;  %964 = vpow2.f32 %v838_v57 }
 0x194   :  { %v542_v16 = vmul.f32 %v541_v60, %v1130_v8 }
 0x195   :  { %v844_v5 = vmul.f32 -1.442695, %v307_v52  ;;  %v963_v32 = vpop.eup %962 }
 0x196   :  { %v363_v62 = vpop.permute.xlu1 %362  ;;  %v334_v1 = vpop.permute.xlu0 %333  ;;  %v238_v43 = vadd.f32 1.0, %v963_v32 }
 0x197   :  { %v365_v45 = vadd.f32 %v363_v62, %v357_v40  ;;  %v336_v46 = vadd.f32 %v334_v1, %v328_v39  ;;  %v468_v62 = vmul.f32 %v467_v48, %v1130_v8  ;;  %966 = vpow2.f32 %v844_v5 }
 0x198   :  { %v689_v5 = vstv %s1314_s29 }
 0x19a   :  { %v1241_v63 = vpop.permute.xlu1 %370  ;;  %v1243_v0 = vpop.permute.xlu0 %341 }
 0x19b   :  { %v373_v54 = vadd.f32 %v1241_v63, %v365_v45  ;;  %v344_v55 = vadd.f32 %v1243_v0, %v336_v46  ;;  %v616_v46 = vmul.f32 %v615_v38, %v1130_v8 }
 0x19d   :  { %v850_v9 = vmul.f32 -1.442695, %v344_v55  ;;  %v965_v40 = vpop.eup %964 }
 0x19e   :  { %v1245_v2 = vpop.permute.xlu1 %378  ;;  %v1247_v3 = vpop.permute.xlu0 %399  ;;  %v275_v48 = vadd.f32 1.0, %v965_v40 }
 0x19f   :  { %v402_v58 = vadd.f32 %v1247_v3, %v394_v53  ;;  %v381_v61 = vadd.f32 %v1245_v2, %v373_v54  ;;  %968 = vpow2.f32 %v850_v9 }
 0x1a1   :  { %v856_v15 = vmul.f32 -1.442695, %v381_v61  ;;  %v967_v44 = vpop.eup %966 }
 0x1a2   :  { %v1253_v6 = vpop.permute.xlu1 %436  ;;  %v1255_v7 = vpop.permute.xlu0 %407  ;;  %v312_v55 = vadd.f32 1.0, %v967_v44 }
 0x1a3   :  { %v439_v63 = vadd.f32 %v1253_v6, %v431_v59  ;;  %v410_v0 = vadd.f32 %v1255_v7, %v402_v58  ;;  %970 = vpow2.f32 %v856_v15 }
 0x1a6   :  { %v1261_v13 = vpop.permute.xlu1 %444  ;;  %v1263_v14 = vpop.permute.xlu0 %415 }
 0x1a7   :  { %v447_v3 = vadd.f32 %v1261_v13, %v439_v63  ;;  %v418_v2 = vadd.f32 %v1263_v14, %v410_v0 }
 0x1a9   :  { %v862_v13 = vmul.f32 -1.442695, %v418_v2  ;;  %v969_v47 = vpop.eup %968 }
 0x1aa   :  { %v1272_v21 = vpop.permute.xlu1 %452  ;;  %v474_v22 = vpop.permute.xlu0 %473  ;;  %v349_v58 = vadd.f32 1.0, %v969_v47  ;;  %v389_v47 = vstv %s1336_s11 }
 0x1ab   :  { %v476_v12 = vadd.f32 %v474_v22, %v468_v62  ;;  %v455_v6 = vadd.f32 %v1272_v21, %v447_v3  ;;  %972 = vpow2.f32 %v862_v13  ;;  %v167_v13 = vstv %s1321_s2 }
 0x1ad   :  { %v868_v28 = vmul.f32 -1.442695, %v455_v6  ;;  %v971_v54 = vpop.eup %970 }
 0x1ae   :  { %v511_v33 = vpop.permute.xlu1 %510  ;;  %v482_v34 = vpop.permute.xlu0 %481 }
 0x1af   :  { %v513_v7 = vadd.f32 %v511_v33, %v505_v10  ;;  %v484_v19 = vadd.f32 %v482_v34, %v476_v12  ;;  %974 = vpow2.f32 %v868_v28  ;;  %v278_v28 = vstv %s1325_s8 }
 0x1b0   :  { %976 = vrcp.f32 %v164_v31 }
 0x1b2   :  { %v519_v49 = vpop.permute.xlu1 %518  ;;  %v490_v50 = vpop.permute.xlu0 %489 }
 0x1b3   :  { %v521_v24 = vadd.f32 %v519_v49, %v513_v7  ;;  %v492_v14 = vadd.f32 %v490_v50, %v484_v19  ;;  %v652_v49 = vstv %s1311_s28 }
 0x1b4   :  { %v653_v56 = vmul.f32 %v652_v49, %v1130_v8 }
 0x1b5   :  { %v874_v33 = vmul.f32 -1.442695, %v492_v14  ;;  %v973_v62 = vpop.eup %972 }
 0x1b6   :  { %v527_v1 = vpop.permute.xlu1 %526  ;;  %v548_v4 = vpop.permute.xlu0 %547  ;;  %v423_v11 = vadd.f32 1.0, %v973_v62 }
 0x1b7   :  { %v550_v22 = vadd.f32 %v548_v4, %v542_v16  ;;  %v529_v29 = vadd.f32 %v527_v1, %v521_v24  ;;  %978 = vpow2.f32 %v874_v33  ;;  %v386_v4 = vadd.f32 1.0, %v971_v54 }
 0x1b8   :  { %980 = vrcp.f32 %v201_v36  ;;  %v690_v16 = vmul.f32 %v689_v5, %v1130_v8  ;;  %v241_v24 = vstv %s1323_s3 }
 0x1b9   :  { %v880_v41 = vmul.f32 -1.442695, %v529_v29  ;;  %v975_v63 = vpop.eup %974 }
 0x1ba   :  { %v585_v17 = vpop.permute.xlu1 %584  ;;  %v556_v18 = vpop.permute.xlu0 %555  ;;  %v460_v6 = vadd.f32 1.0, %v975_v63  ;;  %v537_v63 = vstv %s1348_s15 }
 0x1bb   :  { %v587_v21 = vadd.f32 %v585_v17, %v579_v20  ;;  %v558_v30 = vadd.f32 %v556_v18, %v550_v22  ;;  %982 = vpow2.f32 %v880_v41  ;;  %v977_v10 = vpop.eup %976  ;;  %v204_v18 = vstv %s1318_s7 }
 0x1bc   :  { %984 = vrcp.f32 %v238_v43  ;;  %v168_v31 = vmul.f32 %v977_v10, %v167_v13  ;;  %v352_v41 = vstv %s1332_s10 }
 0x1be   :  { %v593_v25 = vpop.permute.xlu1 %592  ;;  %v564_v26 = vpop.permute.xlu0 %563 }
 0x1bf   :  { %v595_v34 = vadd.f32 %v593_v25, %v587_v21  ;;  %v566_v35 = vadd.f32 %v564_v26, %v558_v30 }
 0x1c1   :  { %v886_v45 = vmul.f32 -1.442695, %v566_v35  ;;  %v979_v12 = vpop.eup %978  ;;  %v315_v35 = vstv %s1328_s9 }
 0x1c2   :  { %v601_v37 = vpop.permute.xlu1 %600  ;;  %v622_v39 = vpop.permute.xlu0 %621  ;;  %v497_v14 = vadd.f32 1.0, %v979_v12 }
 0x1c3   :  { %v603_v42 = vadd.f32 %v601_v37, %v595_v34  ;;  %v624_v53 = vadd.f32 %v622_v39, %v616_v46  ;;  %986 = vpow2.f32 %v886_v45  ;;  %v981_v17 = vpop.eup %980 }
 0x1c4   :  { %988 = vrcp.f32 %v275_v48  ;;  %v205_v25 = vmul.f32 %v981_v17, %v204_v18  ;;  %v611_v17 = vstv %s1354_s17 }
 0x1c5   :  { %v892_v52 = vmul.f32 -1.442695, %v603_v42  ;;  %v983_v7 = vpop.eup %982 }
 0x1c6   :  { %v659_v50 = vpop.permute.xlu1 %658  ;;  %v630_v51 = vpop.permute.xlu0 %629  ;;  %v534_v29 = vadd.f32 1.0, %v983_v7  ;;  %v206_v37 = vadd.f32 %v205_v25, %v168_v31 }
 0x1c7   :  { %v632_v57 = vadd.f32 %v630_v51, %v624_v53  ;;  %990 = vpow2.f32 %v892_v52  ;;  %v661_v1 = vadd.f32 %v659_v50, %v653_v56  ;;  %v985_v23 = vpop.eup %984  ;;  %v426_v52 = vstv %s1339_s12 }
 0x1c8   :  { %992 = vrcp.f32 %v312_v55  ;;  %v242_v32 = vmul.f32 %v985_v23, %v241_v24  ;;  %v685_v24 = vstv %s903_s4 }
 0x1c9   :  { %994 = vrcp.f32 %v349_v58 }
 0x1ca   :  { %v667_v59 = vpop.permute.xlu1 %666  ;;  %v638_v61 = vpop.permute.xlu0 %637  ;;  %v243_v44 = vadd.f32 %v242_v32, %v206_v37 }
 0x1cb   :  { %v640_v60 = vadd.f32 %v638_v61, %v632_v57  ;;  %v669_v0 = vadd.f32 %v667_v59, %v661_v1  ;;  %v463_v57 = vstv %s1342_s13  ;;  %v500_v1 = vstv %s1345_s14 }
 0x1cd   :  { %v898_v9 = vmul.f32 -1.442695, %v640_v60  ;;  %v987_v8 = vpop.eup %986 }
 0x1ce   :  { %v675_v3 = vpop.permute.xlu1 %674  ;;  %v696_v2 = vpop.permute.xlu0 %695  ;;  %v571_v36 = vadd.f32 1.0, %v987_v8 }
 0x1cf   :  { %996 = vpow2.f32 %v898_v9  ;;  %v677_v15 = vadd.f32 %v675_v3, %v669_v0  ;;  %v698_v20 = vadd.f32 %v696_v2, %v690_v16  ;;  %v989_v27 = vpop.eup %988  ;;  %v574_v3 = vstv %s1351_s16 }
 0x1d0   :  { %998 = vrcp.f32 %v386_v4  ;;  %v279_v38 = vmul.f32 %v989_v27, %v278_v28 }
 0x1d1   :  { %v904_v19 = vmul.f32 -1.442695, %v677_v15  ;;  %1000 = vrcp.f32 %v423_v11  ;;  %v991_v30 = vpop.eup %990 }
 0x1d2   :  { %v704_v22 = vpop.permute.xlu0 %703  ;;  %v712_v21 = vpop.permute.xlu1 %711  ;;  %v608_v42 = vadd.f32 1.0, %v991_v30  ;;  %v280_v49 = vadd.f32 %v279_v38, %v243_v44 }
 0x1d3   :  { %1002 = vpow2.f32 %v904_v19  ;;  %v706_v26 = vadd.f32 %v704_v22, %v698_v20  ;;  %v993_v34 = vpop.eup %992  ;;  %v648_v19 = vstv %s897_s18 }
 0x1d4   :  { %1004 = vrcp.f32 %v460_v6  ;;  %v995_v40 = vpop.eup %994  ;;  %v316_v45 = vmul.f32 %v993_v34, %v315_v35 }
 0x1d5   :  { %v714_v33 = vadd.f32 %v712_v21, %v706_v26  ;;  %1006 = vrcp.f32 %v497_v14  ;;  %v353_v50 = vmul.f32 %v995_v40, %v352_v41  ;;  %v722_v26 = vstv %s909_s25 }
 0x1d6   :  { %1008 = vrcp.f32 %v534_v29  ;;  %v317_v54 = vadd.f32 %v316_v45, %v280_v49 }
 0x1d7   :  { %v910_v39 = vmul.f32 -1.442695, %v714_v33 }
 0x1d8   :  { %v354_v59 = vadd.f32 %v353_v50, %v317_v54 }
 0x1d9   :  { %v997_v43 = vpop.eup %996  ;;  %1010 = vpow2.f32 %v910_v39 }
 0x1da   :  { %v999_v46 = vpop.eup %998  ;;  %1012 = vrcp.f32 %v571_v36  ;;  %v645_v48 = vadd.f32 1.0, %v997_v43  ;;  %v788_v36 = vlaneseq }
 0x1db   :  { %v1001_v51 = vpop.eup %1000  ;;  %1014 = vrcp.f32 %v608_v42  ;;  %v390_v55 = vmul.f32 %v999_v46, %v389_v47 }
 0x1dc   :  { %1016 = vrcp.f32 %v645_v48  ;;  %v427_v61 = vmul.f32 %v1001_v51, %v426_v52  ;;  %v789_v37 = vand.u32 127, %v788_v36 }
 0x1dd   :  { %v1003_v53 = vpop.eup %1002  ;;  %v391_v60 = vadd.f32 %v390_v55, %v354_v59 }
 0x1de   :  { %v1005_v56 = vpop.eup %1004  ;;  %v682_v58 = vadd.f32 1.0, %v1003_v53  ;;  %vm790_vm3 = vcmp.lt.s32.totalorder %v789_v37, 100 }
 0x1df   :  { %v1007_v62 = vpop.eup %1006  ;;  %v464_v4 = vmul.f32 %v1005_v56, %v463_v57  ;;  %v428_v9 = vadd.f32 %v427_v61, %v391_v60 }
 0x1e0   :  { %1018 = vrcp.f32 %v682_v58  ;;  %v1009_v5 = vpop.eup %1008  ;;  %v501_v10 = vmul.f32 %v1007_v62, %v500_v1 }
 0x1e1   :  { %v465_v12 = vadd.f32 %v464_v4, %v428_v9  ;;  %v538_v15 = vmul.f32 %v1009_v5, %v537_v63 }
 0x1e3   :  { %v1011_v0 = vpop.eup %1010  ;;  %v502_v18 = vadd.f32 %v501_v10, %v465_v12 }
 0x1e4   :  { %v1013_v11 = vpop.eup %1012  ;;  %v719_v2 = vadd.f32 1.0, %v1011_v0 }
 0x1e5   :  { %v1015_v16 = vpop.eup %1014  ;;  %v575_v6 = vmul.f32 %v1013_v11, %v574_v3  ;;  %v539_v20 = vadd.f32 %v538_v15, %v502_v18 }
 0x1e6   :  { %1020 = vrcp.f32 %v719_v2  ;;  %v1017_v7 = vpop.eup %1016  ;;  %v612_v23 = vmul.f32 %v1015_v16, %v611_v17 }
 0x1e7   :  { %v576_v14 = vadd.f32 %v575_v6, %v539_v20  ;;  %v649_v22 = vmul.f32 %v1017_v7, %v648_v19 }
 0x1e9   :  { %v613_v8 = vadd.f32 %v612_v23, %v576_v14 }
 0x1ea   :  { %v1019_v13 = vpop.eup %1018 }
 0x1eb   :  { %v686_v25 = vmul.f32 %v1019_v13, %v685_v24  ;;  %v650_v27 = vadd.f32 %v649_v22, %v613_v8 }
 0x1ed   :  { %v687_v29 = vadd.f32 %v686_v25, %v650_v27 }
 0x1f0   :  { %v1021_v28 = vpop.eup %1020 }
 0x1f1   :  { %v723_v21 = vmul.f32 %v1021_v28, %v722_v26 }
 0x1f3   :  { %v724_v30 = vadd.f32 %v723_v21, %v687_v29 }
 0x1f5   :  { %v911_v31 = vmul.f32 -1.442695, %v724_v30 }
 0x1f7   :  { %1022 = vpow2.f32 %v911_v31 }
 0x201   :  { %v1023_v32 = vpop.eup %1022 }
 0x202   :  { %v728_v33 = vadd.f32 1.0, %v1023_v32 }
 0x204   :  { %1024 = vrcp.f32 %v728_v33 }
 0x20e   :  { %v1025_v34 = vpop.eup %1024 }
 0x20f   :  { %v731_v35 = vpack.c.bf16 %v1025_v34, %v1025_v34 }
 0x211   :  { %940 = vmatmul.mubr.msk.bf16.vlgmr.msra.gmra.mrb[0].mxu1 %vm744_vm2, %v731_v35 }
 0x2e4   :  { %v782_v38 = vpop.f32.mrb[0].mxu1 }
 0x2e5   :  { %v941_v39 = vpop.f32.mrb[1].mxu1  ;;  %v791_v40 = vsel %vm790_vm3, %v782_v38, -inf }
 0x2e6   :  { %792 = vmax.xlane.f32.xlu0 %v791_v40  ;;  %v785_v41 = vpop.f32.mrb[2].mxu1 }
 0x2e7   :  { %v942_v42 = vpop.f32.mrb[3].mxu1 }
 0x373   :  { %v793_v43 = vpop.xlane.xlu0 %792 }
 0x374   :  { %v794_v44 = vsub.f32 %v791_v40, %v793_v43 }
 0x376   :  { %v795_v45 = vmul.f32 1.442695, %v794_v44 }
 0x378   :  { %1026 = vpow2.f32 %v795_v45 }
 0x382   :  { %v1027_v46 = vpop.eup %1026 }
 0x383   :  { %797 = vadd.xlane.f32.xlu1 %v1027_v46 }
 0x410   :  { %v798_v47 = vpop.xlane.xlu1 %797 }
 0x411   :  { %1028 = vrcp.f32 %v798_v47 }
 0x41b   :  { %v1029_v48 = vpop.eup %1028 }
 0x41c   :  { %v800_v49 = vmul.f32 %v1029_v48, %v1027_v46 }
 0x41e   :  { %801 = vst [vmem:[%s1368_s5] sm:$0xff] %v800_v49 }
 0x41f   :  { %810 = vsyncpa [#allocation3], 1 }
 0x420   :  { %811 = vsyncpa [#allocation5], 1 }

</bundles_post_ra>
